<compile_context>
chip_gen: v6e
topology: v6e:2x2x1
jax: 0.10.0
libtpu: 0.0.40
codegen_flags: <defaults>
</compile_context>

<pallas_src>
import functools

import jax
import jax.numpy as jnp
import numpy as np
from jax.experimental import pallas as pl
from jax.experimental.pallas import tpu as pltpu

_LANE = 128


def _ceil_to(x, m):
    return ((x + m - 1) // m) * m


def _vmem_limit_bytes():
    try:
        kind = jax.devices()[0].device_kind.lower()
    except Exception:
        kind = ""
    if ("v5" in kind) or ("v6" in kind):
        return 96 * 1024 * 1024          # 128 MiB physical on v5e/v6e
    return 48 * 1024 * 1024              # conservative (v7x: 64 MiB / TC)


_VMEM_LIMIT = _vmem_limit_bytes()


# -----------------------------------------------------------------------------
# Kernel A: fused (PamUpSamper + 1x1 + 3x3) conv + BN + ReLU + masked softmax
# -----------------------------------------------------------------------------
def _attention_kernel(width, rows, x_ref, w_ref, shift_ref, mask_ref, out_ref):
    # x_ref:     (1, 1, SLAB, Cin) bf16  halo'd row-tile of padded, flattened [f3 | raw attn]
    # w_ref:     (9, Cin, Cp)      bf16  stacked per-tap weights (1x1, W_up, BN scale folded)
    # shift_ref: (1, Cp)           f32   BN shift (zero on padded lanes)
    # mask_ref:  (1, Cp)           f32   0 on real lanes, -1e30 on padded lanes
    # out_ref:   (1, rows*width, Cp) bf16 compact softmax rows (junk columns dropped)
    w2 = width + 2
    npos = rows * w2                               # positions incl. 2 junk cols per row

    acc = None                                     # start from first tap (no zeros-init)
    for kh in range(3):
        for kw in range(3):
            k = kh * 3 + kw
            off = kh * w2 + kw                     # static flat-row offset of this tap
            tap = x_ref[0, 0, off:off + npos, :]
            d = jnp.dot(tap, w_ref[k], preferred_element_type=jnp.float32)
            acc = d if acc is None else acc + d

    y = jnp.maximum(acc + shift_ref[...], 0.0)     # BN (eval) affine + ReLU
    y = y + mask_ref[...]                          # additive lane mask (after ReLU)
    m = jnp.max(y, axis=-1, keepdims=True)
    p = jnp.exp(y - m)
    s = jnp.sum(p, axis=-1, keepdims=True)
    soft = (p * pl.reciprocal(s, approx=True)).astype(out_ref.dtype)   # EUP divide

    # compact store: drop the 2 junk columns of every image row
    for r in range(rows):
        out_ref[0, r * width:(r + 1) * width, :] = soft[r * w2:r * w2 + width, :]


def attention_pallas(x_tiled, w_p, shift_p, mask_p, *, H, W, row_tile):
    B, T, SLAB, Cin = x_tiled.shape
    Cp = w_p.shape[2]
    kernel = functools.partial(_attention_kernel, W, row_tile)
    return pl.pallas_call(
        kernel,
        out_shape=jax.ShapeDtypeStruct((B, H * W, Cp), jnp.bfloat16),
        grid_spec=pltpu.PrefetchScalarGridSpec(
            num_scalar_prefetch=0,
            grid=(B, T),
            in_specs=[
                pl.BlockSpec((1, 1, SLAB, Cin), lambda b, t: (b, t, 0, 0)),
                pl.BlockSpec((9, Cin, Cp), lambda b, t: (0, 0, 0)),
                pl.BlockSpec((1, Cp), lambda b, t: (0, 0)),
                pl.BlockSpec((1, Cp), lambda b, t: (0, 0)),
            ],
            out_specs=pl.BlockSpec((1, row_tile * W, Cp), lambda b, t: (b, t, 0)),
        ),
        compiler_params=pltpu.CompilerParams(
            dimension_semantics=("parallel", "parallel"),
            vmem_limit_bytes=_VMEM_LIMIT,
        ),
    )(x_tiled, w_p, shift_p, mask_p)


# -----------------------------------------------------------------------------
# Kernel B: Bap — (features * attn_head) -> 1x1 embedding + BN -> GeM pool (p=3)
# -----------------------------------------------------------------------------
def _bap_kernel(hw_total, num_heads, f_ref, attn_ref, w_ref, bns_ref, bnb_ref,
                out_ref, acc_ref):
    # grid = (B, T);  f_ref: (1, hw_tile, Cf) bf16,  attn_ref: (1, hw_tile, Cp) bf16
    # w_ref: (A, Cf, Dp) bf16 (resident), bns/bnb: (A, 1, Dp) f32, out_ref: (1, A, Dp) f32
    # acc_ref: (A, Dp) f32 scratch — running sum of clamp(emb)^3 over spatial tiles
    t = pl.program_id(1)

    @pl.when(t == 0)
    def _():
        acc_ref[...] = jnp.zeros_like(acc_ref)

    f_blk = f_ref[0]                                    # (hw_tile, Cf)  bf16
    attn_blk = attn_ref[0]                              # (hw_tile, Cp) bf16

    rows = []
    for a in range(num_heads):                          # heads innermost: f/attn read once
        aw = attn_blk[:, a:a + 1]                       # static lane slice of head column
        aif = f_blk * aw                                # bf16 elementwise (f32 on v5e via cast)
        emb = jnp.dot(aif, w_ref[a], preferred_element_type=jnp.float32)   # (hw_tile, Dp)
        emb = emb * bns_ref[a] + bnb_ref[a]             # Embedding BN (eval)
        x = jnp.maximum(emb, 1e-6)                      # GeM clamp
        rows.append(jnp.sum(x * x * x, axis=0, keepdims=True))            # (1, Dp)
    acc_ref[...] += jnp.concatenate(rows, axis=0)       # (A, Dp)

    @pl.when(t == pl.num_programs(1) - 1)
    def _():
        mean = acc_ref[...] * (1.0 / hw_total)          # spatial mean
        out_ref[0] = jnp.exp(jnp.log(mean) * (1.0 / 3.0))   # pow(1/p), p=3 (EUP)


def bap_pallas(f4_flat, attn_full, wemb, bns, bnb, *, hw_tile=None):
    B, HW, Cf = f4_flat.shape
    Cp = attn_full.shape[2]
    A, _, Dp = wemb.shape
    if hw_tile is None or hw_tile >= HW:
        hw_tile = HW
    assert HW % hw_tile == 0 and hw_tile % 8 == 0
    T = HW // hw_tile
    kernel = functools.partial(_bap_kernel, HW, A)
    return pl.pallas_call(
        kernel,
        out_shape=jax.ShapeDtypeStruct((B, A, Dp), jnp.float32),
        grid_spec=pltpu.PrefetchScalarGridSpec(
            num_scalar_prefetch=0,
            grid=(B, T),
            in_specs=[
                pl.BlockSpec((1, hw_tile, Cf), lambda b, t: (b, t, 0)),
                pl.BlockSpec((1, hw_tile, Cp), lambda b, t: (b, t, 0)),
                pl.BlockSpec((A, Cf, Dp), lambda b, t: (0, 0, 0)),
                pl.BlockSpec((A, 1, Dp), lambda b, t: (0, 0, 0)),
                pl.BlockSpec((A, 1, Dp), lambda b, t: (0, 0, 0)),
            ],
            out_specs=pl.BlockSpec((1, A, Dp), lambda b, t: (b, 0, 0)),
            scratch_shapes=[pltpu.VMEM((A, Dp), jnp.float32)],
        ),
        compiler_params=pltpu.CompilerParams(
            dimension_semantics=("parallel", "arbitrary"),
            vmem_limit_bytes=_VMEM_LIMIT,
        ),
    )(f4_flat, attn_full, wemb, bns, bnb)


# -----------------------------------------------------------------------------
# Glue: layout prep + parameter folding
# -----------------------------------------------------------------------------
def make_params(key, input_dim, out_dim, attention_num):
    Cf, Dout, A = input_dim, out_dim, attention_num
    Ca = A + 1
    Cin = Cf + Ca
    Cp = _ceil_to(Ca, _LANE)
    Dp = _ceil_to(Dout, _LANE)
    ks = jax.random.split(key, 6)

    def kaiming(k, shape, fan_in):
        return jax.random.normal(k, shape, jnp.float32) * np.sqrt(2.0 / fan_in)

    # ---- original (PyTorch-layout) parameters -------------------------------
    w_up = kaiming(ks[0], (Ca, Ca), Ca)                 # PamUpSamper 1x1 (out,in), no bias
    w1 = kaiming(ks[1], (Ca, Cin), Cin)                 # BasicConv2d 1x1 (out,in)
    w3 = kaiming(ks[2], (Ca, Cin, 3, 3), Cin * 9)       # BasicConv2d 3x3 (out,in,kh,kw)
    bn_gamma = 1.0 + 0.01 * jax.random.normal(ks[3], (Ca,), jnp.float32)
    bn_beta = jnp.zeros((Ca,), jnp.float32)
    wemb = kaiming(ks[4], (A, Dout, Cf), Cf)            # Bap embedding 1x1 per head
    emb_gamma = 1.0 + 0.01 * jax.random.normal(ks[5], (A, Dout), jnp.float32)
    emb_beta = jnp.zeros((A, Dout), jnp.float32)

    # eval-mode BN (running_mean=0, running_var=1)
    bn_scale_vec = bn_gamma / jnp.sqrt(1.0 + 1e-5)
    bn_shift_vec = bn_beta
    emb_scale = emb_gamma / jnp.sqrt(1.0 + 1e-5)
    emb_shift = emb_beta

    # ---- reference-layout params (pure-JAX sanity check) --------------------
    w1_t = w1.T                                         # (Cin, Ca)
    w3_t = jnp.transpose(w3, (2, 3, 1, 0)).reshape(9 * Cin, Ca)
    wemb_t = jnp.transpose(wemb, (0, 2, 1))             # (A, Cf, Dout)

    # ---- kernel-ready params: fold 1x1 into centre tap, fold W_up into the
    # ---- attention rows, fold BN scale, stack [feat|attn] rows, lane-pad, bf16
    w3_taps = jnp.transpose(w3, (2, 3, 1, 0)).reshape(9, Cin, Ca)   # tap = kh*3+kw
    w_eff = w3_taps.at[4].add(w1.T)                                 # centre tap += 1x1
    wa = jnp.einsum("jc,tjo->tco", w_up, w_eff[:, Cf:, :])          # fold W_up (raw attn rows)
    w_stk = jnp.concatenate([w_eff[:, :Cf, :], wa], axis=1)         # (9, Cin, Ca)
    w_stk = w_stk * bn_scale_vec[None, None, :]
    w_p = jnp.zeros((9, Cin, Cp), jnp.float32).at[:, :, :Ca].set(w_stk).astype(jnp.bfloat16)
    shift_p = jnp.zeros((1, Cp), jnp.float32).at[0, :Ca].set(bn_shift_vec)
    mask_p = jnp.where(jnp.arange(Cp) < Ca, 0.0, -1e30).astype(jnp.float32).reshape(1, Cp)

    wemb_p = jnp.zeros((A, Cf, Dp), jnp.float32).at[:, :, :Dout].set(wemb_t).astype(jnp.bfloat16)
    emb_scale_p = jnp.zeros((A, 1, Dp), jnp.float32).at[:, 0, :Dout].set(emb_scale)
    emb_shift_p = jnp.zeros((A, 1, Dp), jnp.float32).at[:, 0, :Dout].set(emb_shift)

    return dict(
        # reference
        w_up=w_up, w1_t=w1_t, w3_t=w3_t,
        bn_scale=bn_scale_vec.reshape(1, Ca), bn_shift=bn_shift_vec.reshape(1, Ca),
        wemb_t=wemb_t, emb_scale=emb_scale, emb_shift=emb_shift,
        # kernel
        w_p=w_p, shift_p=shift_p, mask_p=mask_p,
        wemb_p=wemb_p, emb_scale_p=emb_scale_p, emb_shift_p=emb_shift_p,
        A=A, Ca=Ca, Cf=Cf, Dout=Dout)


def guide_dualscale_attention(features_l3, features_l4, attentions, params, *,
                              row_tile=None, hw_tile=None):
    """Inputs are PyTorch-style NCHW float32 arrays."""
    B, Cf, H, W = features_l3.shape
    A, Dout = params["A"], params["Dout"]
    W2 = W + 2

    if row_tile is None or row_tile >= H:
        row_tile = H
    assert H % row_tile == 0 and (row_tile * W) % 8 == 0
    T = H // row_tile

    # --- Kernel A glue: concat [f3 | raw attentions], pad, flatten, halo'd row tiles ---
    f3 = jnp.transpose(features_l3, (0, 2, 3, 1))                    # (B,H,W,Cf)
    at = jnp.transpose(attentions, (0, 2, 3, 1))                     # (B,H,W,Ca)
    x = jnp.concatenate([f3, at], axis=-1)                           # (B,H,W,Cin)
    xp = jnp.pad(x, ((0, 0), (1, 2), (1, 1), (0, 0)))                # +1 top, +2 bottom, +1 l/r
    xflat = xp.reshape(B, (H + 3) * W2, x.shape[-1])
    slab = (row_tile + 2) * W2 + 2                                   # tile rows + 3x3 halo
    x_tiled = jnp.stack(
        [xflat[:, t * row_tile * W2: t * row_tile * W2 + slab, :] for t in range(T)],
        axis=1).astype(jnp.bfloat16)                                 # (B, T, slab, Cin)

    soft = attention_pallas(x_tiled, params["w_p"], params["shift_p"], params["mask_p"],
                            H=H, W=W, row_tile=row_tile)             # (B, H*W, Cp) bf16
    Cp = soft.shape[-1]
    selected_attentions = jnp.transpose(
        soft.reshape(B, H, W, Cp)[..., :A].astype(jnp.float32), (0, 3, 1, 2))   # (B,A,H,W)

    # --- Kernel B: Bap (per-head embedding + GeM pooling); attn fed as bf16 directly ---
    f4_flat = jnp.transpose(features_l4, (0, 2, 3, 1)).reshape(B, H * W, Cf).astype(jnp.bfloat16)
    pooled_p = bap_pallas(f4_flat, soft, params["wemb_p"],
                          params["emb_scale_p"], params["emb_shift_p"],
                          hw_tile=hw_tile)                           # (B, A, Dp)
    pooled = pooled_p[:, :, :Dout]                                   # (B, A, Dout)

    bap_AiF_features = [pooled[:, i, :] for i in range(A)]
    bap_features = jax.nn.relu(pooled.reshape(B, A * Dout))
    return selected_attentions, bap_AiF_features, bap_features


# -----------------------------------------------------------------------------
# Pure-JAX reference (un-folded math, f32) for sanity check
# -----------------------------------------------------------------------------
def im2col3x3(x_nhwc):
    B, H, W, C = x_nhwc.shape
    xp = jnp.pad(x_nhwc, ((0, 0), (1, 1), (1, 1), (0, 0)))
    cols = []
    for kh in range(3):
        for kw in range(3):
            cols.append(xp[:, kh:kh + H, kw:kw + W, :])
    col = jnp.stack(cols, axis=3)                 # (B, H, W, 9, C)
    return col.reshape(B * H * W, 9 * C)


def reference(features_l3, features_l4, attentions, params):
    B, Cf, H, W = features_l3.shape
    A, Ca, Dout = params["A"], params["Ca"], params["Dout"]
    up = jnp.einsum("oc,bchw->bohw", params["w_up"], attentions)
    x = jnp.concatenate([features_l3, up], axis=1)
    x_nhwc = jnp.transpose(x, (0, 2, 3, 1))
    Cin = Cf + Ca
    X = x_nhwc.reshape(B * H * W, Cin)
    Xcol = im2col3x3(x_nhwc)
    y = (jnp.dot(X, params["w1_t"], precision="highest")
         + jnp.dot(Xcol, params["w3_t"], precision="highest"))
    y = y * params["bn_scale"] + params["bn_shift"]
    y = jnp.maximum(y, 0.0)
    soft = jax.nn.softmax(y, axis=-1).reshape(B, H, W, Ca)
    sel = soft[..., :A]
    sel_nchw = jnp.transpose(sel, (0, 3, 1, 2))
    f4 = jnp.transpose(features_l4, (0, 2, 3, 1)).reshape(B, H * W, Cf)
    pooled = []
    for i in range(A):
        aif = f4 * sel.reshape(B, H * W, A)[:, :, i:i + 1]
        emb = jnp.einsum("bnc,cd->bnd", aif, params["wemb_t"][i], precision="highest")
        emb = emb * params["emb_scale"][i] + params["emb_shift"][i]
        xg = jnp.maximum(emb, 1e-6) ** 3.0
        pooled.append(jnp.mean(xg, axis=1) ** (1.0 / 3.0))
    pooled = jnp.stack(pooled, axis=1)
    bap = jax.nn.relu(pooled.reshape(B, A * Dout))
    return sel_nchw, pooled, bap


if __name__ == "__main__":
    B, Cf, H, W = 2, 4, 16, 16
    A = 2
    Dout = 8
    Ca = A + 1

    key = jax.random.PRNGKey(0)
    k_p, k1, k2, k3 = jax.random.split(key, 4)
    params = make_params(k_p, input_dim=Cf, out_dim=Dout, attention_num=A)

    features_l3 = jax.random.normal(k1, (B, Cf, H, W), jnp.float32)
    features_l4 = jax.random.normal(k2, (B, Cf, H, W), jnp.float32)
    attentions = jax.random.normal(k3, (B, Ca, H, W), jnp.float32)

    sel, aif_list, bap = guide_dualscale_attention(
        features_l3, features_l4, attentions, params, row_tile=8, hw_tile=None)
    jax.block_until_ready(sel)
    jax.block_until_ready(bap)
    for a in aif_list:
        jax.block_until_ready(a)

    # sanity check against pure-JAX f32 reference (kernels use bf16 operands / outputs)
    sel_ref, pooled_ref, bap_ref = reference(features_l3, features_l4, attentions, params)
    np.testing.assert_allclose(np.asarray(sel), np.asarray(sel_ref), rtol=3e-2, atol=1e-2)
    np.testing.assert_allclose(np.asarray(bap), np.asarray(bap_ref), rtol=3e-2, atol=1e-2)

    print("KERNEL_OK")
</pallas_src>

<mosaic_0001>
module attributes {stable_mosaic.version = 11 : i64} {
  func.func @_attention_kernel(%arg0: i32, %arg1: i32, %arg2: memref<1x1x182x7xbf16, #tpu.memory_space<vmem>>, %arg3: memref<9x7x128xbf16, #tpu.memory_space<vmem>>, %arg4: memref<1x128xf32, #tpu.memory_space<vmem>>, %arg5: memref<1x128xf32, #tpu.memory_space<vmem>>, %arg6: memref<1x128x128xbf16, #tpu.memory_space<vmem>>) attributes {dimension_semantics = [#tpu.dimension_semantics<parallel>, #tpu.dimension_semantics<parallel>], iteration_bounds = array<i64: 2, 2>, scalar_prefetch = 0 : i64, scratch_operands = 0 : i64, tpu.core_type = #tpu.core_type<tc>, window_params = [{transform_indices = @transform_0, window_bounds = array<i64: 1, 1, 182, 7>}, {pipeline_mode = #tpu.pipeline_mode<synchronous>, transform_indices = @transform_1, window_bounds = array<i64: 9, 7, 128>}, {pipeline_mode = #tpu.pipeline_mode<synchronous>, transform_indices = @transform_2, window_bounds = array<i64: 1, 128>}, {pipeline_mode = #tpu.pipeline_mode<synchronous>, transform_indices = @transform_3, window_bounds = array<i64: 1, 128>}, {transform_indices = @transform_4, window_bounds = array<i64: 1, 128, 128>}]} {
    %c0 = arith.constant 0 : index
    %c0_0 = arith.constant 0 : index
    %c0_1 = arith.constant 0 : index
    %c0_2 = arith.constant 0 : index
    %0 = vector.load %arg2[%c0, %c0_0, %c0_1, %c0_2] : memref<1x1x182x7xbf16, #tpu.memory_space<vmem>>, vector<1x1x144x7xbf16>
    %1 = vector.shape_cast %0 : vector<1x1x144x7xbf16> to vector<144x7xbf16>
    %c0_3 = arith.constant 0 : index
    %c0_4 = arith.constant 0 : index
    %c0_5 = arith.constant 0 : index
    %2 = vector.load %arg3[%c0_3, %c0_4, %c0_5] : memref<9x7x128xbf16, #tpu.memory_space<vmem>>, vector<1x7x128xbf16>
    %3 = vector.shape_cast %2 : vector<1x7x128xbf16> to vector<7x128xbf16>
    %cst = arith.constant dense<0.000000e+00> : vector<144x128xf32>
    %4 = tpu.matmul %1, %3, %cst {dimension_numbers = #tpu.dot_dimension_numbers<[1], [0], [0], [1], [0, 0, 1, 1], [], []>} : vector<144x7xbf16>, vector<7x128xbf16>, vector<144x128xf32> -> vector<144x128xf32>
    %c0_6 = arith.constant 0 : index
    %c0_7 = arith.constant 0 : index
    %c1 = arith.constant 1 : index
    %c0_8 = arith.constant 0 : index
    %5 = vector.load %arg2[%c0_6, %c0_7, %c1, %c0_8] : memref<1x1x182x7xbf16, #tpu.memory_space<vmem>>, vector<1x1x144x7xbf16>
    %6 = vector.shape_cast %5 : vector<1x1x144x7xbf16> to vector<144x7xbf16>
    %c1_9 = arith.constant 1 : index
    %c0_10 = arith.constant 0 : index
    %c0_11 = arith.constant 0 : index
    %7 = vector.load %arg3[%c1_9, %c0_10, %c0_11] : memref<9x7x128xbf16, #tpu.memory_space<vmem>>, vector<1x7x128xbf16>
    %8 = vector.shape_cast %7 : vector<1x7x128xbf16> to vector<7x128xbf16>
    %cst_12 = arith.constant dense<0.000000e+00> : vector<144x128xf32>
    %9 = tpu.matmul %6, %8, %cst_12 {dimension_numbers = #tpu.dot_dimension_numbers<[1], [0], [0], [1], [0, 0, 1, 1], [], []>} : vector<144x7xbf16>, vector<7x128xbf16>, vector<144x128xf32> -> vector<144x128xf32>
    %10 = arith.addf %4, %9 : vector<144x128xf32>
    %c0_13 = arith.constant 0 : index
    %c0_14 = arith.constant 0 : index
    %c2 = arith.constant 2 : index
    %c0_15 = arith.constant 0 : index
    %11 = vector.load %arg2[%c0_13, %c0_14, %c2, %c0_15] : memref<1x1x182x7xbf16, #tpu.memory_space<vmem>>, vector<1x1x144x7xbf16>
    %12 = vector.shape_cast %11 : vector<1x1x144x7xbf16> to vector<144x7xbf16>
    %c2_16 = arith.constant 2 : index
    %c0_17 = arith.constant 0 : index
    %c0_18 = arith.constant 0 : index
    %13 = vector.load %arg3[%c2_16, %c0_17, %c0_18] : memref<9x7x128xbf16, #tpu.memory_space<vmem>>, vector<1x7x128xbf16>
    %14 = vector.shape_cast %13 : vector<1x7x128xbf16> to vector<7x128xbf16>
    %cst_19 = arith.constant dense<0.000000e+00> : vector<144x128xf32>
    %15 = tpu.matmul %12, %14, %cst_19 {dimension_numbers = #tpu.dot_dimension_numbers<[1], [0], [0], [1], [0, 0, 1, 1], [], []>} : vector<144x7xbf16>, vector<7x128xbf16>, vector<144x128xf32> -> vector<144x128xf32>
    %16 = arith.addf %10, %15 : vector<144x128xf32>
    %c0_20 = arith.constant 0 : index
    %c0_21 = arith.constant 0 : index
    %c18 = arith.constant 18 : index
    %c0_22 = arith.constant 0 : index
    %17 = vector.load %arg2[%c0_20, %c0_21, %c18, %c0_22] : memref<1x1x182x7xbf16, #tpu.memory_space<vmem>>, vector<1x1x144x7xbf16>
    %18 = vector.shape_cast %17 : vector<1x1x144x7xbf16> to vector<144x7xbf16>
    %c3 = arith.constant 3 : index
    %c0_23 = arith.constant 0 : index
    %c0_24 = arith.constant 0 : index
    %19 = vector.load %arg3[%c3, %c0_23, %c0_24] : memref<9x7x128xbf16, #tpu.memory_space<vmem>>, vector<1x7x128xbf16>
    %20 = vector.shape_cast %19 : vector<1x7x128xbf16> to vector<7x128xbf16>
    %cst_25 = arith.constant dense<0.000000e+00> : vector<144x128xf32>
    %21 = tpu.matmul %18, %20, %cst_25 {dimension_numbers = #tpu.dot_dimension_numbers<[1], [0], [0], [1], [0, 0, 1, 1], [], []>} : vector<144x7xbf16>, vector<7x128xbf16>, vector<144x128xf32> -> vector<144x128xf32>
    %22 = arith.addf %16, %21 : vector<144x128xf32>
    %c0_26 = arith.constant 0 : index
    %c0_27 = arith.constant 0 : index
    %c19 = arith.constant 19 : index
    %c0_28 = arith.constant 0 : index
    %23 = vector.load %arg2[%c0_26, %c0_27, %c19, %c0_28] : memref<1x1x182x7xbf16, #tpu.memory_space<vmem>>, vector<1x1x144x7xbf16>
    %24 = vector.shape_cast %23 : vector<1x1x144x7xbf16> to vector<144x7xbf16>
    %c4 = arith.constant 4 : index
    %c0_29 = arith.constant 0 : index
    %c0_30 = arith.constant 0 : index
    %25 = vector.load %arg3[%c4, %c0_29, %c0_30] : memref<9x7x128xbf16, #tpu.memory_space<vmem>>, vector<1x7x128xbf16>
    %26 = vector.shape_cast %25 : vector<1x7x128xbf16> to vector<7x128xbf16>
    %cst_31 = arith.constant dense<0.000000e+00> : vector<144x128xf32>
    %27 = tpu.matmul %24, %26, %cst_31 {dimension_numbers = #tpu.dot_dimension_numbers<[1], [0], [0], [1], [0, 0, 1, 1], [], []>} : vector<144x7xbf16>, vector<7x128xbf16>, vector<144x128xf32> -> vector<144x128xf32>
    %28 = arith.addf %22, %27 : vector<144x128xf32>
    %c0_32 = arith.constant 0 : index
    %c0_33 = arith.constant 0 : index
    %c20 = arith.constant 20 : index
    %c0_34 = arith.constant 0 : index
    %29 = vector.load %arg2[%c0_32, %c0_33, %c20, %c0_34] : memref<1x1x182x7xbf16, #tpu.memory_space<vmem>>, vector<1x1x144x7xbf16>
    %30 = vector.shape_cast %29 : vector<1x1x144x7xbf16> to vector<144x7xbf16>
    %c5 = arith.constant 5 : index
    %c0_35 = arith.constant 0 : index
    %c0_36 = arith.constant 0 : index
    %31 = vector.load %arg3[%c5, %c0_35, %c0_36] : memref<9x7x128xbf16, #tpu.memory_space<vmem>>, vector<1x7x128xbf16>
    %32 = vector.shape_cast %31 : vector<1x7x128xbf16> to vector<7x128xbf16>
    %cst_37 = arith.constant dense<0.000000e+00> : vector<144x128xf32>
    %33 = tpu.matmul %30, %32, %cst_37 {dimension_numbers = #tpu.dot_dimension_numbers<[1], [0], [0], [1], [0, 0, 1, 1], [], []>} : vector<144x7xbf16>, vector<7x128xbf16>, vector<144x128xf32> -> vector<144x128xf32>
    %34 = arith.addf %28, %33 : vector<144x128xf32>
    %c0_38 = arith.constant 0 : index
    %c0_39 = arith.constant 0 : index
    %c36 = arith.constant 36 : index
    %c0_40 = arith.constant 0 : index
    %35 = vector.load %arg2[%c0_38, %c0_39, %c36, %c0_40] : memref<1x1x182x7xbf16, #tpu.memory_space<vmem>>, vector<1x1x144x7xbf16>
    %36 = vector.shape_cast %35 : vector<1x1x144x7xbf16> to vector<144x7xbf16>
    %c6 = arith.constant 6 : index
    %c0_41 = arith.constant 0 : index
    %c0_42 = arith.constant 0 : index
    %37 = vector.load %arg3[%c6, %c0_41, %c0_42] : memref<9x7x128xbf16, #tpu.memory_space<vmem>>, vector<1x7x128xbf16>
    %38 = vector.shape_cast %37 : vector<1x7x128xbf16> to vector<7x128xbf16>
    %cst_43 = arith.constant dense<0.000000e+00> : vector<144x128xf32>
    %39 = tpu.matmul %36, %38, %cst_43 {dimension_numbers = #tpu.dot_dimension_numbers<[1], [0], [0], [1], [0, 0, 1, 1], [], []>} : vector<144x7xbf16>, vector<7x128xbf16>, vector<144x128xf32> -> vector<144x128xf32>
    %40 = arith.addf %34, %39 : vector<144x128xf32>
    %c0_44 = arith.constant 0 : index
    %c0_45 = arith.constant 0 : index
    %c37 = arith.constant 37 : index
    %c0_46 = arith.constant 0 : index
    %41 = vector.load %arg2[%c0_44, %c0_45, %c37, %c0_46] : memref<1x1x182x7xbf16, #tpu.memory_space<vmem>>, vector<1x1x144x7xbf16>
    %42 = vector.shape_cast %41 : vector<1x1x144x7xbf16> to vector<144x7xbf16>
    %c7 = arith.constant 7 : index
    %c0_47 = arith.constant 0 : index
    %c0_48 = arith.constant 0 : index
    %43 = vector.load %arg3[%c7, %c0_47, %c0_48] : memref<9x7x128xbf16, #tpu.memory_space<vmem>>, vector<1x7x128xbf16>
    %44 = vector.shape_cast %43 : vector<1x7x128xbf16> to vector<7x128xbf16>
    %cst_49 = arith.constant dense<0.000000e+00> : vector<144x128xf32>
    %45 = tpu.matmul %42, %44, %cst_49 {dimension_numbers = #tpu.dot_dimension_numbers<[1], [0], [0], [1], [0, 0, 1, 1], [], []>} : vector<144x7xbf16>, vector<7x128xbf16>, vector<144x128xf32> -> vector<144x128xf32>
    %46 = arith.addf %40, %45 : vector<144x128xf32>
    %c0_50 = arith.constant 0 : index
    %c0_51 = arith.constant 0 : index
    %c38 = arith.constant 38 : index
    %c0_52 = arith.constant 0 : index
    %47 = vector.load %arg2[%c0_50, %c0_51, %c38, %c0_52] : memref<1x1x182x7xbf16, #tpu.memory_space<vmem>>, vector<1x1x144x7xbf16>
    %48 = vector.shape_cast %47 : vector<1x1x144x7xbf16> to vector<144x7xbf16>
    %c8 = arith.constant 8 : index
    %c0_53 = arith.constant 0 : index
    %c0_54 = arith.constant 0 : index
    %49 = vector.load %arg3[%c8, %c0_53, %c0_54] : memref<9x7x128xbf16, #tpu.memory_space<vmem>>, vector<1x7x128xbf16>
    %50 = vector.shape_cast %49 : vector<1x7x128xbf16> to vector<7x128xbf16>
    %cst_55 = arith.constant dense<0.000000e+00> : vector<144x128xf32>
    %51 = tpu.matmul %48, %50, %cst_55 {dimension_numbers = #tpu.dot_dimension_numbers<[1], [0], [0], [1], [0, 0, 1, 1], [], []>} : vector<144x7xbf16>, vector<7x128xbf16>, vector<144x128xf32> -> vector<144x128xf32>
    %52 = arith.addf %46, %51 : vector<144x128xf32>
    %c0_56 = arith.constant 0 : index
    %c0_57 = arith.constant 0 : index
    %53 = vector.load %arg4[%c0_56, %c0_57] : memref<1x128xf32, #tpu.memory_space<vmem>>, vector<1x128xf32>
    %54 = vector.broadcast %53 : vector<1x128xf32> to vector<144x128xf32>
    %55 = arith.addf %52, %54 : vector<144x128xf32>
    %cst_58 = arith.constant 0.000000e+00 : f32
    %56 = vector.broadcast %cst_58 : f32 to vector<144x128xf32>
    %57 = arith.maximumf %55, %56 : vector<144x128xf32>
    %c0_59 = arith.constant 0 : index
    %c0_60 = arith.constant 0 : index
    %58 = vector.load %arg5[%c0_59, %c0_60] : memref<1x128xf32, #tpu.memory_space<vmem>>, vector<1x128xf32>
    %59 = vector.broadcast %58 : vector<1x128xf32> to vector<144x128xf32>
    %60 = arith.addf %57, %59 : vector<144x128xf32>
    %cst_61 = arith.constant dense<0xFF800000> : vector<144xf32>
    %61 = vector.multi_reduction <maximumf>, %60, %cst_61 [1] : vector<144x128xf32> to vector<144xf32>
    %62 = vector.shape_cast %61 : vector<144xf32> to vector<144x1xf32>
    %63 = vector.broadcast %62 : vector<144x1xf32> to vector<144x128xf32>
    %64 = arith.subf %60, %63 : vector<144x128xf32>
    %65 = math.exp %64 : vector<144x128xf32>
    %cst_62 = arith.constant dense<0.000000e+00> : vector<144xf32>
    %66 = vector.multi_reduction <add>, %65, %cst_62 [1] : vector<144x128xf32> to vector<144xf32>
    %67 = vector.shape_cast %66 : vector<144xf32> to vector<144x1xf32>
    %68 = tpu.reciprocal %67 {approx = true} : vector<144x1xf32> -> vector<144x1xf32>
    %69 = vector.broadcast %68 : vector<144x1xf32> to vector<144x128xf32>
    %70 = arith.mulf %65, %69 : vector<144x128xf32>
    %71 = arith.truncf %70 : vector<144x128xf32> to vector<144x128xbf16>
    %72 = vector.extract_strided_slice %71 {offsets = [0, 0], sizes = [16, 128], strides = [1, 1]} : vector<144x128xbf16> to vector<16x128xbf16>
    %c0_63 = arith.constant 0 : index
    %c0_64 = arith.constant 0 : index
    %c0_65 = arith.constant 0 : index
    %73 = vector.load %arg6[%c0_63, %c0_64, %c0_65] : memref<1x128x128xbf16, #tpu.memory_space<vmem>>, vector<1x16x128xbf16>
    %74 = vector.shape_cast %73 : vector<1x16x128xbf16> to vector<16x128xbf16>
    %75 = vector.shape_cast %72 : vector<16x128xbf16> to vector<1x16x128xbf16>
    tpu.vector_store %arg6[%c0_63, %c0_64, %c0_65], %75 {strides = array<i32>} : memref<1x128x128xbf16, #tpu.memory_space<vmem>>, vector<1x16x128xbf16>,
    %76 = vector.extract_strided_slice %71 {offsets = [18, 0], sizes = [16, 128], strides = [1, 1]} : vector<144x128xbf16> to vector<16x128xbf16>
    %c0_66 = arith.constant 0 : index
    %c16 = arith.constant 16 : index
    %c0_67 = arith.constant 0 : index
    %77 = vector.load %arg6[%c0_66, %c16, %c0_67] : memref<1x128x128xbf16, #tpu.memory_space<vmem>>, vector<1x16x128xbf16>
    %78 = vector.shape_cast %77 : vector<1x16x128xbf16> to vector<16x128xbf16>
    %79 = vector.shape_cast %76 : vector<16x128xbf16> to vector<1x16x128xbf16>
    tpu.vector_store %arg6[%c0_66, %c16, %c0_67], %79 {strides = array<i32>} : memref<1x128x128xbf16, #tpu.memory_space<vmem>>, vector<1x16x128xbf16>,
    %80 = vector.extract_strided_slice %71 {offsets = [36, 0], sizes = [16, 128], strides = [1, 1]} : vector<144x128xbf16> to vector<16x128xbf16>
    %c0_68 = arith.constant 0 : index
    %c32 = arith.constant 32 : index
    %c0_69 = arith.constant 0 : index
    %81 = vector.load %arg6[%c0_68, %c32, %c0_69] : memref<1x128x128xbf16, #tpu.memory_space<vmem>>, vector<1x16x128xbf16>
    %82 = vector.shape_cast %81 : vector<1x16x128xbf16> to vector<16x128xbf16>
    %83 = vector.shape_cast %80 : vector<16x128xbf16> to vector<1x16x128xbf16>
    tpu.vector_store %arg6[%c0_68, %c32, %c0_69], %83 {strides = array<i32>} : memref<1x128x128xbf16, #tpu.memory_space<vmem>>, vector<1x16x128xbf16>,
    %84 = vector.extract_strided_slice %71 {offsets = [54, 0], sizes = [16, 128], strides = [1, 1]} : vector<144x128xbf16> to vector<16x128xbf16>
    %c0_70 = arith.constant 0 : index
    %c48 = arith.constant 48 : index
    %c0_71 = arith.constant 0 : index
    %85 = vector.load %arg6[%c0_70, %c48, %c0_71] : memref<1x128x128xbf16, #tpu.memory_space<vmem>>, vector<1x16x128xbf16>
    %86 = vector.shape_cast %85 : vector<1x16x128xbf16> to vector<16x128xbf16>
    %87 = vector.shape_cast %84 : vector<16x128xbf16> to vector<1x16x128xbf16>
    tpu.vector_store %arg6[%c0_70, %c48, %c0_71], %87 {strides = array<i32>} : memref<1x128x128xbf16, #tpu.memory_space<vmem>>, vector<1x16x128xbf16>,
    %88 = vector.extract_strided_slice %71 {offsets = [72, 0], sizes = [16, 128], strides = [1, 1]} : vector<144x128xbf16> to vector<16x128xbf16>
    %c0_72 = arith.constant 0 : index
    %c64 = arith.constant 64 : index
    %c0_73 = arith.constant 0 : index
    %89 = vector.load %arg6[%c0_72, %c64, %c0_73] : memref<1x128x128xbf16, #tpu.memory_space<vmem>>, vector<1x16x128xbf16>
    %90 = vector.shape_cast %89 : vector<1x16x128xbf16> to vector<16x128xbf16>
    %91 = vector.shape_cast %88 : vector<16x128xbf16> to vector<1x16x128xbf16>
    tpu.vector_store %arg6[%c0_72, %c64, %c0_73], %91 {strides = array<i32>} : memref<1x128x128xbf16, #tpu.memory_space<vmem>>, vector<1x16x128xbf16>,
    %92 = vector.extract_strided_slice %71 {offsets = [90, 0], sizes = [16, 128], strides = [1, 1]} : vector<144x128xbf16> to vector<16x128xbf16>
    %c0_74 = arith.constant 0 : index
    %c80 = arith.constant 80 : index
    %c0_75 = arith.constant 0 : index
    %93 = vector.load %arg6[%c0_74, %c80, %c0_75] : memref<1x128x128xbf16, #tpu.memory_space<vmem>>, vector<1x16x128xbf16>
    %94 = vector.shape_cast %93 : vector<1x16x128xbf16> to vector<16x128xbf16>
    %95 = vector.shape_cast %92 : vector<16x128xbf16> to vector<1x16x128xbf16>
    tpu.vector_store %arg6[%c0_74, %c80, %c0_75], %95 {strides = array<i32>} : memref<1x128x128xbf16, #tpu.memory_space<vmem>>, vector<1x16x128xbf16>,
    %96 = vector.extract_strided_slice %71 {offsets = [108, 0], sizes = [16, 128], strides = [1, 1]} : vector<144x128xbf16> to vector<16x128xbf16>
    %c0_76 = arith.constant 0 : index
    %c96 = arith.constant 96 : index
    %c0_77 = arith.constant 0 : index
    %97 = vector.load %arg6[%c0_76, %c96, %c0_77] : memref<1x128x128xbf16, #tpu.memory_space<vmem>>, vector<1x16x128xbf16>
    %98 = vector.shape_cast %97 : vector<1x16x128xbf16> to vector<16x128xbf16>
    %99 = vector.shape_cast %96 : vector<16x128xbf16> to vector<1x16x128xbf16>
    tpu.vector_store %arg6[%c0_76, %c96, %c0_77], %99 {strides = array<i32>} : memref<1x128x128xbf16, #tpu.memory_space<vmem>>, vector<1x16x128xbf16>,
    %100 = vector.extract_strided_slice %71 {offsets = [126, 0], sizes = [16, 128], strides = [1, 1]} : vector<144x128xbf16> to vector<16x128xbf16>
    %c0_78 = arith.constant 0 : index
    %c112 = arith.constant 112 : index
    %c0_79 = arith.constant 0 : index
    %101 = vector.load %arg6[%c0_78, %c112, %c0_79] : memref<1x128x128xbf16, #tpu.memory_space<vmem>>, vector<1x16x128xbf16>
    %102 = vector.shape_cast %101 : vector<1x16x128xbf16> to vector<16x128xbf16>
    %103 = vector.shape_cast %100 : vector<16x128xbf16> to vector<1x16x128xbf16>
    tpu.vector_store %arg6[%c0_78, %c112, %c0_79], %103 {strides = array<i32>} : memref<1x128x128xbf16, #tpu.memory_space<vmem>>, vector<1x16x128xbf16>,
    return
  }
  func.func @transform_0(%arg0: i32, %arg1: i32) -> (i32, i32, i32, i32) {
    %c0_i32 = arith.constant 0 : i32
    %c0_i32_0 = arith.constant 0 : i32
    %c0_i32_1 = arith.constant 0 : i32
    return %arg0, %arg1, %c0_i32, %c0_i32_0 : i32, i32, i32, i32
  }
  func.func @transform_1(%arg0: i32, %arg1: i32) -> (i32, i32, i32) {
    %c0_i32 = arith.constant 0 : i32
    %c0_i32_0 = arith.constant 0 : i32
    %c0_i32_1 = arith.constant 0 : i32
    %c0_i32_2 = arith.constant 0 : i32
    return %c0_i32, %c0_i32_0, %c0_i32_1 : i32, i32, i32
  }
  func.func @transform_2(%arg0: i32, %arg1: i32) -> (i32, i32) {
    %c0_i32 = arith.constant 0 : i32
    %c0_i32_0 = arith.constant 0 : i32
    %c0_i32_1 = arith.constant 0 : i32
    return %c0_i32, %c0_i32_0 : i32, i32
  }
  func.func @transform_3(%arg0: i32, %arg1: i32) -> (i32, i32) {
    %c0_i32 = arith.constant 0 : i32
    %c0_i32_0 = arith.constant 0 : i32
    %c0_i32_1 = arith.constant 0 : i32
    return %c0_i32, %c0_i32_0 : i32, i32
  }
  func.func @transform_4(%arg0: i32, %arg1: i32) -> (i32, i32, i32) {
    %c0_i32 = arith.constant 0 : i32
    %c0_i32_0 = arith.constant 0 : i32
    return %arg0, %arg1, %c0_i32 : i32, i32, i32
  }
}

</mosaic_0001>

<bundles_post_ra>
// kernel: tpu_custom_call.1
= control target key start
LH: loop header
LB: loop body
LE: loop exit
PB: predicated region body
PF: predicated region fallthrough
CT: control target
= control target key end

     0   :  { %9 = vsyncpa [#allocation3], 0  ;;  %s4767_s0 = inlined_call_operand.vmem [shape: bf16[2,2,182,7], index: 0, kind: input, shape index: {}]   ;;  %s4768_s1 = inlined_call_operand.vmem [shape: bf16[9,7,128], index: 1, kind: input, shape index: {}]   ;;  %s4769_s2 = inlined_call_operand.vmem [shape: f32[1,128], index: 2, kind: input, shape index: {}]   ;;  %s4770_s3 = inlined_call_operand.vmem [shape: f32[1,128], index: 3, kind: input, shape index: {}]   ;;  %s4771_s4 = inlined_call_operand.hbm [shape: bf16[2,256,128], index: 4, kind: output, shape index: {}]  }
   0x1   :  { %11 = vsyncpa [#allocation3 + $0x1], 0  ;;  %s3560_s15 = smov 0   ;;  %s3562_s16 = smov 0  }
   0x2   :  { %s3564_s17 = smov 0   ;;  %s3566_s18 = smov 0  }
   0x3   :  { %s3568_s19 = smov 0   ;;  %s3570_s20 = smov 0  }
   0x4   :  { %s3572_s21 = smov 0   ;;  %s3574_s22 = smov 0  }
   0x5 LB: > { %s2624_s23 = sadd.s32 4294967295, %s3527_s22   ;;  %s2625_s24 = sadd.s32 4294967294, %s3527_s22   ;;  %s3527_s22 = sphi %s3574_s22, %s17_s22   ;;  %s3523_s21 = sphi %s3572_s21, %s4786_s21   ;;  %s3519_s20 = sphi %s3570_s20, %s4785_s20   ;;  %s3515_s19 = sphi %s3568_s19, %s4784_s19   ;;  %s3511_s18 = sphi %s3566_s18, %s4783_s18   ;;  %s3507_s17 = sphi %s3564_s17, %s4782_s17   ;;  %s3503_s16 = sphi %s3562_s16, %s4781_s16   ;;  %s3499_s15 = sphi %s3560_s15, %s4780_s15  }
   0x6   : > { %s26_s25 = sadd.s32 1, %s3519_s20  ;;  %s29_s26 = sadd.s32 1, %s3523_s21 }
   0x7   : > { %p27_p0 = scmp.ge.s32.totalorder %s26_s25, 2  ;;  %p139_p1 = scmp.ne.s32.totalorder %s3507_s17, %s3503_s16 }
   0x8   : > { %p140_p2 = scmp.eq.s32.totalorder %s2624_s23, 3  ;;  %p145_p5 = scmp.ne.s32.totalorder %s3503_s16, %s3499_s15 }
   0x9   : > { %s4788_s25 = smov (%p27_p0, %s26_s25), 0  ;;  %s4790_s26 = smov (!%p27_p0, %s29_s26), %s3523_s21 }
   0xa   : > { %s125_s27 = ssub.s32 %s3519_s20, %s4788_s25  ;;  %p3611_p3 = por %p140_p2, %p139_p1 }
   0xb   : > { %p31_p4 = scmp.ge.s32.totalorder %s4790_s26, 2  ;;  %p146_p6 = scmp.eq.s32.totalorder %s2625_s24, 3 }
   0xc   : > { %p2628_p7 = scmp.ge.s32.totalorder %s3527_s22, 1  ;;  %p185_p9 = scmp.lt.s32.totalorder %s3527_s22, 5 }
   0xd   : > { %s4792_s26 = smov (%p31_p4, %s4790_s26), 0  ;;  %p3620_p8 = por %p146_p6, %p145_p5 }
   0xe   : > { %s124_s30 = ssub.s32 %s3523_s21, %s4792_s26  ;;  %s129_s5 = sadd.s32 1, %s3507_s17 }
   0xf   : > { %s126_s6 = sor.u32 %s125_s27, %s124_s30  ;;  %p186_p10 = pnand %p2628_p7, %p185_p9 }
  0x10   : > { %p127_p11 = scmp.eq.s32.totalorder %s126_s6, 0  ;;  %p215_p12 = scmp.lt.s32.totalorder (!%p186_p10), %s3515_s19, 1 }
  0x11   : > { %189 = sbr.rel (%p186_p10) target bundleno = 897 (0x381), region = 36  ;;  %p217_p13 = scmp.lt.s32.totalorder (!%p186_p10), %s3511_s18, 1 }
  0x12   : > { %s3629_s7 = scalar_select %p127_p11, %s3507_s17, %s129_s5  }
  0x13   : > { %s2782_s24 = sshll.u32 (!%p186_p10), %s3511_s18, 4  ;;  %s2783_s27 = sshll.u32 (!%p186_p10), %s3515_s19, 5 }
  0x14   : > { %s2536_s5 = sadd.s32 (!%p186_p10), %s2783_s27, %s2782_s24 }
  0x16   : > { %v2631_v0 = vld [vmem:[%s4768_s1 + $0x4] sm:$0xf]  ;;  %vm401_vm0 = vcmask 1042432   ;;  %vm402_vm1 = vcmask 1043456   ;;  %v3529_v1 = vmov 0.0   ;;  %v3530_v2 = vmov 65535  }
  0x17   : > { %2906 = vmatprep.subr.bf16.mxu0 %v3529_v1  ;;  %3248 = vmatprep.subr.bf16.mxu1 %v3529_v1  ;;  %v403_v3 = vsel %vm401_vm0, 4294967295, %v3530_v2  ;;  %vm3531_vm2 = vmmov 0   ;;  %s216_s10 = scalar_select %p215_p12, %s3515_s19, 1  ;;  %vm296_vm3 = vsmask.f32 7424  ;;  %vm373_vm4 = vcmask 56320  }
  0x18   : > { %v3639_v4 = vsel %vm402_vm1, %v403_v3, 0  ;;  %2908 = vmatprep.mubr.msk.bf16.mxu0 %vm3531_vm2, %v3529_v1  ;;  %2928 = vmatprep.mubr.msk.bf16.mxu1 %vm3531_vm2, %v3529_v1  ;;  %s218_s11 = scalar_select %p217_p13, %s3511_s18, 1  ;;  %v2660_v10 = vld [vmem:[%s4768_s1 + $0x8] sm:$0xf]  ;;  %v244_v16 = vld [vmem:[%s4768_s1] sm:$0xf] }
  0x19   : > { %v406_v5 = vand.u32 %v2631_v0, %v3639_v4  ;;  %s3251_s12 = smul.u32 46, %s216_s10  ;;  %v693_v27 = vand.u32 %v2660_v10, %v3639_v4  ;;  %v532_v30 = vand.u32 %v3639_v4, %v244_v16  ;;  %vm645_vm5 = vcmask 1046528   ;;  %s2784_s18 = sshll.u32 %s2536_s5, 6 }
  0x1a   : > { %s3250_s13 = smul.u32 23, %s218_s11  ;;  %vm1314_vm6 = vcmask 1045504   ;;  %vm1065_vm7 = vsmask.f32 6400  ;;  %vm1734_vm8 = vsmask.f32 5376  ;;  %s4706_s9 = scalar_lea.hbm %s4771_s4, %s2784_s18 }
  0x1b   : > { %2907 = vmatpush3.bf16.msra.mxu0 %v406_v5  ;;  %3249 = vmatpush3.bf16.msra.mxu1 %v406_v5  ;;  %vm1983_vm9 = vcmask 1044480   ;;  %vm2413_vm10 = vcmask 1046532   ;;  %vm2431_vm12 = vcmask 1041408   ;;  %vm2432_vm13 = vcmask 1045508   ;;  %s3532_s11 = smov [#allocation2]  }
  0x1c   : > { %2982 = vmatprep.subr.bf16.mxu0 %v3529_v1  ;;  %2944 = vmatprep.subr.bf16.mxu1 %v3529_v1  ;;  %s221_s14 = sadd.s32 %s3251_s12, %s3250_s13  ;;  %s212_s13 = sand.u32 1, %s3503_s16   ;;  %vm4641_vm11 = vmor %vm401_vm0, %vm2413_vm10  ;;  %vm2450_vm15 = vcmask 1040384   ;;  %vm2451_vm0 = vcmask 1044484  }
  0x1d   : > { %s2630_s23 = sshll.u32 %s221_s14, 2  ;;  %s2629_s14 = sshll.u32 %s212_s13, 6  ;;  %vm4653_vm14 = vmor %vm2431_vm12, %vm2432_vm13 }
  0x1e   : > { %s3653_s30 = scalar_lea.vmem %s4767_s0, %s2630_s23  ;;  %s4635_s23 = scalar_lea.vmem [#allocation2], %s2629_s14  ;;  %vm4665_vm1 = vmor %vm2450_vm15, %vm2451_vm0 }
  0x1f   : > { %v226_v6 = vld [vmem:[%s3653_s30] sm:$0xf]  ;;  %v3657_v7 = vld [vmem:[%s3653_s30 + $0x4] sm:$0xf]  ;;  %v3663_v9 = vld [vmem:[%s3653_s30 + $0x8] sm:$0xff]   ;;  %s2539_s19 = sshll.u32 %s4635_s23, 4  ;;  %s4708_s19 = int_to_ptr.vmem [resolvable:$true] %s2539_s19 }
  0x20   : > { %v3660_v8 = vcombine.low %v226_v6, %v3657_v7  ;;  %v305_v13 = vshll.u32 %v3663_v9, 16  ;;  %v3672_v14 = vld [vmem:[%s3653_s30 + $0x28] sm:$0xff]   ;;  %v3675_v15 = vld [vmem:[%s3653_s30 + $0x30] sm:$0xff]   ;;  %v3684_v18 = vld [vmem:[%s3653_s30 + $0x38] sm:$0xff]   ;;  %v309_v24 = vshrl.u32 %v3663_v9, 16  ;;  %s3435_s10 = scalar_lea.vmem %s4708_s19, 1024 }
  0x21   : > { %v3681_v17 = vld [vmem:[%s3653_s30 + $0x10] sm:$0xff]   ;;  %v337_v21 = vshll.u32 %v3672_v14, 16  ;;  %v341_v22 = vshrl.u32 %v3672_v14, 16  ;;  %v345_v23 = vshll.u32 %v3675_v15, 16  ;;  %v349_v33 = vshrl.u32 %v3675_v15, 16  ;;  %v3701_v35 = vld [vmem:[%s3653_s30 + $0x18] sm:$0xff]   ;;  %p3436_p0 = scmp.ne.s32.totalorder %s4708_s19, %s3435_s10 }
  0x22   : > { %v298_v11 = vshrl.u32 %v3660_v8, 16  ;;  %v300_v12 = vshll.u32 %v3660_v8, 16  ;;  %v307_v20 = vrot.slane %v305_v13, 1  ;;  %v313_v28 = vshll.u32 %v3681_v17, 16  ;;  %v3711_v41 = vld [vmem:[%s3653_s30 + $0x40] sm:$0xff]   ;;  %s3439_s12 = sshll.u32 %s3532_s11, 4  ;;  %s3440_s12 = int_to_ptr.vmem [resolvable:$false] %s3439_s12 }
  0x23   : > { %v3690_v26 = vrot.slane %v337_v21, 1  ;;  %v347_v29 = vrot.slane %v345_v23, 1  ;;  %v353_v34 = vshll.u32 %v3684_v18, 16  ;;  %v321_v42 = vshll.u32 %v3701_v35, 16  ;;  %v3723_v50 = vld [vmem:[%s3653_s30 + $0x20] sm:$0xff]   ;;  %p3437_p1 = pnand %p3436_p0, %p3611_p3  ;;  %s3441_s14 = scalar_lea.vmem %s3440_s12, 2048 }
  0x24   : > { %v302_v19 = vrot.slane %v300_v12, 1  ;;  %v311_v37 = vor.u32 %v309_v24, %v307_v20  ;;  %v315_v38 = vrot.slane %v313_v28, 1  ;;  %v317_v44 = vshrl.u32 %v3681_v17, 16  ;;  %v3337_v45 = vld [vmem:[%s3653_s30 + $0x48] ss:$0 sps:$4 sm:$0x11]   ;;  %p3442_p4 = scmp.lt.s32.totalorder %s4708_s19, %s3440_s12  ;;  %p3443_p5 = scmp.lt.s32.totalorder %s3441_s14, %s3435_s10 }
  0x25   : > { %v343_v32 = vor.u32 %v341_v22, %v3690_v26  ;;  %v351_v39 = vor.u32 %v349_v33, %v347_v29  ;;  %v355_v40 = vrot.slane %v353_v34, 1  ;;  %v357_v47 = vshrl.u32 %v3684_v18, 16  ;;  %v639_v12 = vld [vmem:[%s3653_s30] sm:$0xe]  ;;  %v2671_v13 = vld [vmem:[%s4768_s1 + $0xc] sm:$0xf]  ;;  %p3438_p2 = pneg %p3437_p1 }
  0x26   : > { %v303_v25 = vor.u32 %v302_v19, %v298_v11  ;;  %v316_v43 = vsel %vm296_vm3, %v311_v37, %v315_v38  ;;  %v361_v48 = vshll.u32 %v3711_v41, 16  ;;  %v323_v49 = vrot.slane %v321_v42, 1  ;;  %v2691_v23 = vld [vmem:[%s4768_s1 + $0x10] sm:$0xf]  ;;  %p3444_p6 = por %p3443_p5, %p3442_p4 }
  0x27   : > { %v348_v36 = vsel %vm296_vm3, %v343_v32, %v347_v29  ;;  %v356_v46 = vsel %vm296_vm3, %v351_v39, %v355_v40  ;;  %v319_v51 = vor.u32 %v317_v44, %v315_v38  ;;  %v661_v52 = vrot.slane %v3711_v41, 1  ;;  %v3791_v28 = vld [vmem:[%s3653_s30 + $0x10] sm:$0xff]   ;;  %v3799_v32 = vld [vmem:[%s3653_s30 + $0x18] sm:$0xff]   ;;  %v3823_v39 = vld [vmem:[%s3653_s30 + $0x20] sm:$0xff]  }
  0x28   : > { %v308_v31 = vsel %vm296_vm3, %v303_v25, %v307_v20  ;;  %2929 = vmatmul.mubr.msk.bf16.vlgmr.msra.gmra.mxu1 %vm373_vm4, %v348_v36  ;;  %v663_v53 = vrot.slane %v3337_v45, 1  ;;  %v359_v54 = vor.u32 %v357_v47, %v355_v40  ;;  %v363_v55 = vrot.slane %v361_v48, 1  ;;  %v819_v25 = vld [vmem:[%s3653_s30 + $0xc] sm:$0xf]  ;;  %p3445_p7 = pnand %p3444_p6, %p3438_p2 }
  0x29   : > { %2909 = vmatmul.mubr.msk.bf16.vlgmr.msra.gmra.mxu0 %vm373_vm4, %v308_v31  ;;  %2945 = vmatpush3.bf16.msra.mxu1 %v532_v30  ;;  %v324_v57 = vsel %vm296_vm3, %v319_v51, %v323_v49  ;;  %v325_v58 = vshrl.u32 %v3701_v35, 16  ;;  %v329_v59 = vshll.u32 %v3723_v50, 16  ;;  %v365_v61 = vshrl.u32 %v3711_v41, 16  ;;  %v3839_v44 = vld [vmem:[%s3653_s30 + $0x28] sm:$0xff]  }
  0x2a   : > { %2983 = vmatpush3.bf16.msra.mxu0 %v693_v27  ;;  %2912 = vmatprep.mubr.msk.bf16.mxu0 %vm3531_vm2, %v3529_v1  ;;  %v3734_v56 = vsel %vm645_vm5, %v661_v52, %v663_v53  ;;  %v364_v60 = vsel %vm296_vm3, %v359_v54, %v363_v55  ;;  %v369_v62 = vshll.u32 %v3337_v45, 16  ;;  %v333_v6 = vshrl.u32 %v3723_v50, 16  ;;  %v818_v54 = vld [vmem:[%s3653_s30 + $0x8] sm:$0xe] }
  0x2b   : > { %3058 = vmatprep.subr.bf16.mxu0 %v3529_v1  ;;  %2932 = vmatprep.mubr.msk.bf16.mxu1 %vm3531_vm2, %v3529_v1  ;;  %v327_v63 = vor.u32 %v325_v58, %v323_v49  ;;  %v331_v0 = vrot.slane %v329_v59, 1  ;;  %v367_v2 = vor.u32 %v365_v61, %v363_v55  ;;  %v2661_v19 = vcombine.low %v639_v12, %v3657_v7  ;;  %v3855_v49 = vld [vmem:[%s3653_s30 + $0x30] sm:$0xff]   ;;  %v2713_v12 = vld [vmem:[%s4768_s1 + $0x18] sm:$0xf] }
  0x2c   : > { %3020 = vmatprep.subr.bf16.mxu1 %v3529_v1  ;;  %v371_v3 = vrot.slane %v369_v62, 1  ;;  %v934_v20 = vand.u32 %v2671_v13, %v3639_v4  ;;  %v647_v22 = vrot.slane %v3663_v9, 1  ;;  %v1183_v24 = vand.u32 %v2691_v23, %v3639_v4  ;;  %v2702_v61 = vld [vmem:[%s4768_s1 + $0x14] sm:$0xf] }
  0x2d   : > { %v332_v5 = vsel %vm296_vm3, %v327_v63, %v331_v0  ;;  %v335_v11 = vor.u32 %v333_v6, %v331_v0  ;;  %v646_v21 = vrot.slane %v2661_v19, 1  ;;  %v1316_v31 = vrot.slane %v3791_v28, 2 }
  0x2e   : > { %v372_v10 = vsel %vm296_vm3, %v367_v2, %v371_v3  ;;  %v1318_v34 = vrot.slane %v3799_v32, 2  ;;  %v653_v38 = vrot.slane %v3723_v50, 1  ;;  %v1320_v40 = vrot.slane %v3823_v39, 2 }
  0x2f   : > { %v340_v16 = vsel %vm296_vm3, %v335_v11, %v3690_v26  ;;  %v648_v7 = vsel %vm645_vm5, %v646_v21, %v647_v22  ;;  %v1308_v26 = vld [vmem:[%s3653_s30 + $0x8] sm:$0xc]  ;;  %v655_v42 = vrot.slane %v3672_v14, 1  ;;  %v1322_v45 = vrot.slane %v3839_v44, 2 }
  0x30   : > { %2933 = vmatmul.mubr.msk.bf16.gmra.mxu1 %vm373_vm4, %v356_v46  ;;  %v2703_v29 = vcombine.low %v1308_v26, %v819_v25  ;;  %v3811_v37 = vsel %vm1314_vm6, %v1316_v31, %v1318_v34  ;;  %v657_v46 = vrot.slane %v3675_v15, 1  ;;  %v659_v51 = vrot.slane %v3684_v18, 1 }
  0x31   : > { %2913 = vmatmul.mubr.msk.bf16.gmra.mxu0 %vm373_vm4, %v316_v43  ;;  %2936 = vmatprep.mubr.msk.bf16.mxu1 %vm3531_vm2, %v3529_v1  ;;  %v3831_v43 = vsel %vm1314_vm6, %v1318_v34, %v1320_v40  ;;  %v3847_v47 = vsel %vm1314_vm6, %v1320_v40, %v1322_v45  ;;  %v2672_v55 = vcombine.low %v818_v54, %v819_v25  ;;  %v1075_v59 = vshrl.u32 %v3791_v28, 16 }
  0x32   : > { %2916 = vmatprep.mubr.msk.bf16.mxu0 %vm3531_vm2, %v3529_v1  ;;  %v1315_v30 = vrot.slane %v2703_v29, 2  ;;  %v658_v48 = vsel %vm645_vm5, %v655_v42, %v657_v46  ;;  %v660_v53 = vsel %vm645_vm5, %v657_v46, %v659_v51  ;;  %v1087_v11 = vshll.u32 %v3799_v32, 16  ;;  %v3950_v46 = vld [vmem:[%s3653_s30 + $0x38] sm:$0xff]  }
  0x33   : > { %v1070_v58 = vshll.u32 %v2672_v55, 16  ;;  %v1077_v0 = vrot.slane %v1075_v59, 1  ;;  %v1093_v23 = vshrl.u32 %v3823_v39, 16  ;;  %v1102_v29 = vshrl.u32 %v3839_v44, 16  ;;  %v3964_v59 = vld [vmem:[%s3653_s30 + $0x40] sm:$0xff]  }
  0x34   : > { %v3802_v33 = vsel %vm1314_vm6, %v1315_v30, %v1316_v31  ;;  %v1105_v30 = vshll.u32 %v3839_v44, 16  ;;  %v894_v31 = vrot.slane %v3839_v44, 1  ;;  %v896_v40 = vrot.slane %v3855_v49, 1 }
  0x35   : > { %v1072_v63 = vrot.slane %v1070_v58, 2  ;;  %v1095_v25 = vrot.slane %v1093_v23, 1  ;;  %v898_v54 = vrot.slane %v3950_v46, 1 }
  0x36   : > { %v1107_v34 = vrot.slane %v1105_v30, 2 }
  0x37   : > { %v899_v58 = vsel %vm645_vm5, %v896_v40, %v898_v54 }
  0x38   : > { %2937 = vmatmul.mubr.msk.bf16.gmra.mxu1 %vm373_vm4, %v364_v60  ;;  %v887_v60 = vrot.slane %v2672_v55, 1 }
  0x39   : > { %2917 = vmatmul.mubr.msk.bf16.gmra.mxu0 %vm373_vm4, %v324_v57  ;;  %2940 = vmatprep.mubr.msk.bf16.mxu1 %vm3531_vm2, %v3529_v1  ;;  %v1067_v57 = vshrl.u32 %v2672_v55, 16 }
  0x3a   : > { %2920 = vmatprep.mubr.msk.bf16.mxu0 %vm3531_vm2, %v3529_v1 }
  0x3b   : > { %v1069_v62 = vrot.slane %v1067_v57, 1 }
  0x40   : > { %2941 = vmatmul.mubr.msk.bf16.gmra.mxu1 %vm373_vm4, %v372_v10  ;;  %v1084_v10 = vshrl.u32 %v3799_v32, 16 }
  0x41   : > { %2921 = vmatmul.mubr.msk.bf16.gmra.mxu0 %vm373_vm4, %v332_v5  ;;  %2946 = vmatprep.mubr.msk.bf16.mxu1 %vm3531_vm2, %v3529_v1  ;;  %v1362_v5 = vand.u32 %v2702_v61, %v3639_v4  ;;  %v900_v61 = vrot.slane %v3964_v59, 1 }
  0x42   : > { %2924 = vmatprep.mubr.msk.bf16.mxu0 %vm3531_vm2, %v3529_v1  ;;  %v1086_v19 = vrot.slane %v1084_v10, 1 }
  0x48   : > { %2947 = vmatmul.mubr.msk.bf16.vlgmr.msra.gmra.mxu1 %vm373_vm4, %v3660_v8  ;;  %v649_v8 = vrot.slane %v3681_v17, 1 }
  0x49   : > { %2925 = vmatmul.mubr.msk.bf16.gmra.mxu0 %vm373_vm4, %v340_v16  ;;  %3021 = vmatpush3.bf16.msra.mxu1 %v934_v20  ;;  %v1603_v16 = vand.u32 %v2713_v12, %v3639_v4  ;;  %v1089_v20 = vrot.slane %v1087_v11, 2 }
  0x4a   : > { %2984 = vmatprep.mubr.msk.bf16.mxu0 %vm3531_vm2, %v3529_v1  ;;  %2950 = vmatprep.mubr.msk.bf16.mxu1 %vm3531_vm2, %v3529_v1  ;;  %v650_v27 = vsel %vm645_vm5, %v647_v22, %v649_v8 }
  0x4b   : > { %3096 = vmatprep.subr.bf16.mxu1 %v3529_v1  ;;  %v1090_v22 = vor.u32 %v1089_v20, %v1086_v19  ;;  %v3348_v19 = vld [vmem:[%s3653_s30 + $0x50] ss:$0 sps:$4 sm:$0x11]  }
  0x4c   : > { %v904_v23 = vrot.slane %v3348_v19, 1  ;;  %v4112_v19 = vld [vmem:[%s3653_s30 + $0x40] sm:$0xff]  }
  0x50   : > { %2951 = vmatmul.mubr.msk.bf16.gmra.mxu1 %vm373_vm4, %v3663_v9  ;;  %v651_v9 = vrot.slane %v3701_v35, 1 }
  0x51   : > { %2985 = vmatmul.mubr.msk.bf16.vlgmr.msra.gmra.mxu0 %vm373_vm4, %v648_v7  ;;  %2954 = vmatprep.mubr.msk.bf16.mxu1 %vm3531_vm2, %v3529_v1  ;;  %v1096_v7 = vshll.u32 %v3823_v39, 16 }
  0x52   : > { %3059 = vmatpush3.bf16.msra.mxu0 %v1183_v24  ;;  %2988 = vmatprep.mubr.msk.bf16.mxu0 %vm3531_vm2, %v3529_v1  ;;  %v652_v36 = vsel %vm645_vm5, %v649_v8, %v651_v9  ;;  %v892_v24 = vrot.slane %v3823_v39, 1  ;;  %v1114_v39 = vshll.u32 %v3855_v49, 16 }
  0x53   : > { %3134 = vmatprep.subr.bf16.mxu0 %v3529_v1  ;;  %v1098_v26 = vrot.slane %v1096_v7, 2 }
  0x54   : > { %v1116_v44 = vrot.slane %v1114_v39, 2 }
  0x58   : > { %2955 = vmatmul.mubr.msk.bf16.gmra.mxu1 %vm373_vm4, %v3681_v17  ;;  %v654_v17 = vsel %vm645_vm5, %v651_v9, %v653_v38 }
  0x59   : > { %2989 = vmatmul.mubr.msk.bf16.gmra.mxu0 %vm373_vm4, %v650_v27  ;;  %2958 = vmatprep.mubr.msk.bf16.mxu1 %vm3531_vm2, %v3529_v1 }
  0x5a   : > { %2992 = vmatprep.mubr.msk.bf16.mxu0 %vm3531_vm2, %v3529_v1 }
  0x60   : > { %2959 = vmatmul.mubr.msk.bf16.gmra.mxu1 %vm373_vm4, %v3701_v35  ;;  %v656_v35 = vsel %vm645_vm5, %v653_v38, %v655_v42 }
  0x61   : > { %2993 = vmatmul.mubr.msk.bf16.gmra.mxu0 %vm373_vm4, %v652_v36  ;;  %2962 = vmatprep.mubr.msk.bf16.mxu1 %vm3531_vm2, %v3529_v1  ;;  %v895_v36 = vsel %vm645_vm5, %v892_v24, %v894_v31 }
  0x62   : > { %2996 = vmatprep.mubr.msk.bf16.mxu0 %vm3531_vm2, %v3529_v1 }
  0x68   : > { %2963 = vmatmul.mubr.msk.bf16.gmra.mxu1 %vm373_vm4, %v3723_v50  ;;  %v1324_v50 = vrot.slane %v3855_v49, 2 }
  0x69   : > { %2997 = vmatmul.mubr.msk.bf16.gmra.mxu0 %vm373_vm4, %v654_v17  ;;  %2966 = vmatprep.mubr.msk.bf16.mxu1 %vm3531_vm2, %v3529_v1  ;;  %v1111_v17 = vshrl.u32 %v3855_v49, 16  ;;  %v1328_v49 = vrot.slane %v3964_v59, 2 }
  0x6a   : > { %3000 = vmatprep.mubr.msk.bf16.mxu0 %vm3531_vm2, %v3529_v1 }
  0x70   : > { %2967 = vmatmul.mubr.msk.bf16.gmra.mxu1 %vm373_vm4, %v3672_v14  ;;  %v3865_v14 = vsel %vm1314_vm6, %v1322_v45, %v1324_v50  ;;  %v897_v45 = vsel %vm645_vm5, %v894_v31, %v896_v40  ;;  %v4041_v40 = vld [vmem:[%s3653_s30 + $0x20] sm:$0xff]  }
  0x71   : > { %3001 = vmatmul.mubr.msk.bf16.gmra.mxu0 %vm373_vm4, %v656_v35  ;;  %2970 = vmatprep.mubr.msk.bf16.mxu1 %vm3531_vm2, %v3529_v1  ;;  %v1113_v35 = vrot.slane %v1111_v17, 1 }
  0x72   : > { %3004 = vmatprep.mubr.msk.bf16.mxu0 %vm3531_vm2, %v3529_v1 }
  0x78   : > { %2971 = vmatmul.mubr.msk.bf16.gmra.mxu1 %vm373_vm4, %v3675_v15  ;;  %v662_v15 = vsel %vm645_vm5, %v659_v51, %v661_v52  ;;  %v888_v52 = vrot.slane %v3791_v28, 1  ;;  %v1120_v51 = vshrl.u32 %v3950_v46, 16 }
  0x79   : > { %3005 = vmatmul.mubr.msk.bf16.gmra.mxu0 %vm373_vm4, %v658_v48  ;;  %2974 = vmatprep.mubr.msk.bf16.mxu1 %vm3531_vm2, %v3529_v1  ;;  %v1117_v48 = vor.u32 %v1116_v44, %v1113_v35 }
  0x7a   : > { %3008 = vmatprep.mubr.msk.bf16.mxu0 %vm3531_vm2, %v3529_v1  ;;  %v889_v3 = vsel %vm645_vm5, %v887_v60, %v888_v52  ;;  %v1122_v55 = vrot.slane %v1120_v51, 1  ;;  %v1129_v60 = vshrl.u32 %v3964_v59, 16 }
  0x80   : > { %2975 = vmatmul.mubr.msk.bf16.gmra.mxu1 %vm373_vm4, %v3684_v18  ;;  %v1078_v18 = vshll.u32 %v3791_v28, 16  ;;  %v1099_v28 = vor.u32 %v1098_v26, %v1095_v25 }
  0x81   : > { %3009 = vmatmul.mubr.msk.bf16.gmra.mxu0 %vm373_vm4, %v660_v53  ;;  %2978 = vmatprep.mubr.msk.bf16.mxu1 %vm3531_vm2, %v3529_v1  ;;  %v1123_v53 = vshll.u32 %v3950_v46, 16 }
  0x82   : > { %3012 = vmatprep.mubr.msk.bf16.mxu0 %vm3531_vm2, %v3529_v1  ;;  %v1080_v2 = vrot.slane %v1078_v18, 2  ;;  %v1100_v9 = vsel %vm1065_vm7, %v1090_v22, %v1099_v28 }
  0x83   : > { %v1125_v57 = vrot.slane %v1123_v53, 2 }
  0x84   : > { %v1081_v6 = vor.u32 %v1080_v2, %v1077_v0  ;;  %v901_v2 = vsel %vm645_vm5, %v898_v54, %v900_v61  ;;  %v4071_v54 = vld [vmem:[%s3653_s30 + $0x30] sm:$0xff]  }
  0x85   : > { %v1126_v18 = vor.u32 %v1125_v57, %v1122_v55 }
  0x86   : > { %v1091_v8 = vsel %vm1065_vm7, %v1081_v6, %v1090_v22 }
  0x88   : > { %2979 = vmatmul.mubr.msk.bf16.gmra.mxu1 %vm373_vm4, %v3711_v41  ;;  %v1073_v41 = vor.u32 %v1072_v63, %v1069_v62  ;;  %v1127_v62 = vsel %vm1065_vm7, %v1117_v48, %v1126_v18  ;;  %v1131_v63 = vrot.slane %v1129_v60, 1 }
  0x89   : > { %3013 = vmatmul.mubr.msk.bf16.gmra.mxu0 %vm373_vm4, %v662_v15  ;;  %3022 = vmatprep.mubr.msk.bf16.mxu1 %vm3531_vm2, %v3529_v1 }
  0x8a   : > { %3016 = vmatprep.mubr.msk.bf16.mxu0 %vm3531_vm2, %v3529_v1  ;;  %v1082_v13 = vsel %vm1065_vm7, %v1073_v41, %v1081_v6 }
  0x90   : > { %3023 = vmatmul.mubr.msk.bf16.vlgmr.msra.gmra.mxu1 %vm373_vm4, %v889_v3  ;;  %v3978_v3 = vld [vmem:[%s3653_s30 + $0x48] sm:$0xff]  }
  0x91   : > { %3017 = vmatmul.mubr.msk.bf16.gmra.mxu0 %vm373_vm4, %v3734_v56  ;;  %3097 = vmatpush3.bf16.msra.mxu1 %v1362_v5  ;;  %v890_v56 = vrot.slane %v3799_v32, 1  ;;  %v1104_v32 = vrot.slane %v1102_v29, 1  ;;  %v1138_v41 = vshrl.u32 %v3978_v3, 16  ;;  %v1141_v6 = vshll.u32 %v3978_v3, 16  ;;  %v2733_v29 = vld [vmem:[%s4768_s1 + $0x1c] sm:$0xf] }
  0x92   : > { %3060 = vmatprep.mubr.msk.bf16.mxu0 %vm3531_vm2, %v3529_v1  ;;  %3026 = vmatprep.mubr.msk.bf16.mxu1 %vm3531_vm2, %v3529_v1  ;;  %v902_v10 = vrot.slane %v3978_v3, 1 }
  0x93   : > { %3172 = vmatprep.subr.bf16.mxu1 %v3529_v1  ;;  %v891_v21 = vsel %vm645_vm5, %v888_v52, %v890_v56  ;;  %v893_v27 = vsel %vm645_vm5, %v890_v56, %v892_v24  ;;  %v1108_v38 = vor.u32 %v1107_v34, %v1104_v32  ;;  %v1132_v52 = vshll.u32 %v3964_v59, 16 }
  0x94   : > { %v1140_v12 = vrot.slane %v1138_v41, 1  ;;  %v1143_v56 = vrot.slane %v1141_v6, 2  ;;  %v905_v25 = vsel %vm645_vm5, %v902_v10, %v904_v23  ;;  %v1852_v32 = vand.u32 %v2733_v29, %v3639_v4 }
  0x95   : > { %v1109_v42 = vsel %vm1065_vm7, %v1099_v28, %v1108_v38  ;;  %v1118_v15 = vsel %vm1065_vm7, %v1108_v38, %v1117_v48  ;;  %v1134_v0 = vrot.slane %v1132_v52, 2  ;;  %v4011_v28 = vld [vmem:[%s3653_s30 + $0x14] sm:$0xf]  ;;  %v2744_v38 = vld [vmem:[%s4768_s1 + $0x20] sm:$0xf] }
  0x96   : > { %v1144_v20 = vor.u32 %v1143_v56, %v1140_v12  ;;  %v2031_v39 = vand.u32 %v2744_v38, %v3639_v4  ;;  %v4053_v4 = vld [vmem:[%s3653_s30 + $0x28] sm:$0xff]  }
  0x97   : > { %v1135_v5 = vor.u32 %v1134_v0, %v1131_v63  ;;  %v1561_v44 = vrot.slane %v4053_v4, 2  ;;  %v4091_v63 = vld [vmem:[%s3653_s30 + $0x38] sm:$0xff]  }
  0x98   : > { %3027 = vmatmul.mubr.msk.bf16.gmra.mxu1 %vm373_vm4, %v891_v21 }
  0x99   : > { %3061 = vmatmul.mubr.msk.bf16.vlgmr.msra.gmra.mxu0 %vm373_vm4, %v1082_v13  ;;  %3030 = vmatprep.mubr.msk.bf16.mxu1 %vm3531_vm2, %v3529_v1  ;;  %v1136_v11 = vsel %vm1065_vm7, %v1126_v18, %v1135_v5  ;;  %v3991_v13 = vld [vmem:[%s3653_s30 + $0x50] ss:$0 sps:$4 sm:$0x33]   ;;  %v1145_v7 = vsel %vm1065_vm7, %v1135_v5, %v1144_v20 }
  0x9a   : > { %3135 = vmatpush3.bf16.msra.mxu0 %v1603_v16  ;;  %3064 = vmatprep.mubr.msk.bf16.mxu0 %vm3531_vm2, %v3529_v1  ;;  %v903_v16 = vsel %vm645_vm5, %v900_v61, %v902_v10  ;;  %v1147_v21 = vshrl.u32 %v3991_v13, 16  ;;  %v1150_v22 = vshll.u32 %v3991_v13, 16 }
  0x9b   : > { %3210 = vmatprep.subr.bf16.mxu0 %v3529_v1 }
  0x9c   : > { %v1149_v24 = vrot.slane %v1147_v21, 1 }
  0xa0   : > { %3031 = vmatmul.mubr.msk.bf16.gmra.mxu1 %vm373_vm4, %v893_v27  ;;  %v1487_v27 = vld [vmem:[%s3653_s30 + $0x10] sm:$0xc] }
  0xa1   : > { %3065 = vmatmul.mubr.msk.bf16.gmra.mxu0 %vm373_vm4, %v1091_v8  ;;  %3034 = vmatprep.mubr.msk.bf16.mxu1 %vm3531_vm2, %v3529_v1  ;;  %v1152_v8 = vrot.slane %v1150_v22, 2  ;;  %v4020_v31 = vcombine.low %v1487_v27, %v4011_v28 }
  0xa2   : > { %3068 = vmatprep.mubr.msk.bf16.mxu0 %vm3531_vm2, %v3529_v1 }
  0xa3   : > { %v1153_v26 = vor.u32 %v1152_v8, %v1149_v24  ;;  %v1556_v34 = vrot.slane %v4020_v31, 2 }
  0xa5   : > { %v1154_v30 = vsel %vm1065_vm7, %v1144_v20, %v1153_v26  ;;  %v4135_v26 = vld [vmem:[%s3653_s30 + $0x48] sm:$0xff]  }
  0xa6   : > { %v1569_v59 = vrot.slane %v4135_v26, 2 }
  0xa8   : > { %3035 = vmatmul.mubr.msk.bf16.gmra.mxu1 %vm373_vm4, %v895_v36 }
  0xa9   : > { %3069 = vmatmul.mubr.msk.bf16.gmra.mxu0 %vm373_vm4, %v1100_v9  ;;  %3038 = vmatprep.mubr.msk.bf16.mxu1 %vm3531_vm2, %v3529_v1  ;;  %v4023_v9 = vld [vmem:[%s3653_s30 + $0x18] sm:$0xff]  }
  0xaa   : > { %3072 = vmatprep.mubr.msk.bf16.mxu0 %vm3531_vm2, %v3529_v1  ;;  %v1557_v36 = vrot.slane %v4023_v9, 2 }
  0xac   : > { %v1558_v17 = vsel %vm1314_vm6, %v1556_v34, %v1557_v36 }
  0xb0   : > { %3039 = vmatmul.mubr.msk.bf16.gmra.mxu1 %vm373_vm4, %v897_v45 }
  0xb1   : > { %3073 = vmatmul.mubr.msk.bf16.gmra.mxu0 %vm373_vm4, %v1109_v42  ;;  %3042 = vmatprep.mubr.msk.bf16.mxu1 %vm3531_vm2, %v3529_v1 }
  0xb2   : > { %3076 = vmatprep.mubr.msk.bf16.mxu0 %vm3531_vm2, %v3529_v1 }
  0xb8   : > { %3043 = vmatmul.mubr.msk.bf16.gmra.mxu1 %vm373_vm4, %v899_v58 }
  0xb9   : > { %3077 = vmatmul.mubr.msk.bf16.gmra.mxu0 %vm373_vm4, %v1118_v15  ;;  %3046 = vmatprep.mubr.msk.bf16.mxu1 %vm3531_vm2, %v3529_v1 }
  0xba   : > { %3080 = vmatprep.mubr.msk.bf16.mxu0 %vm3531_vm2, %v3529_v1 }
  0xc0   : > { %3047 = vmatmul.mubr.msk.bf16.gmra.mxu1 %vm373_vm4, %v901_v2 }
  0xc1   : > { %3081 = vmatmul.mubr.msk.bf16.gmra.mxu0 %vm373_vm4, %v1127_v62  ;;  %3050 = vmatprep.mubr.msk.bf16.mxu1 %vm3531_vm2, %v3529_v1 }
  0xc2   : > { %3084 = vmatprep.mubr.msk.bf16.mxu0 %vm3531_vm2, %v3529_v1 }
  0xc8   : > { %3051 = vmatmul.mubr.msk.bf16.gmra.mxu1 %vm373_vm4, %v903_v16 }
  0xc9   : > { %3085 = vmatmul.mubr.msk.bf16.gmra.mxu0 %vm373_vm4, %v1136_v11  ;;  %3054 = vmatprep.mubr.msk.bf16.mxu1 %vm3531_vm2, %v3529_v1  ;;  %v1326_v11 = vrot.slane %v3950_v46, 2  ;;  %v1567_v46 = vrot.slane %v4112_v19, 2 }
  0xca   : > { %3088 = vmatprep.mubr.msk.bf16.mxu0 %vm3531_vm2, %v3529_v1 }
  0xd0   : > { %3055 = vmatmul.mubr.msk.bf16.gmra.mxu1 %vm373_vm4, %v905_v25 }
  0xd1   : > { %3089 = vmatmul.mubr.msk.bf16.gmra.mxu0 %vm373_vm4, %v1145_v7  ;;  %3098 = vmatprep.mubr.msk.bf16.mxu1 %vm3531_vm2, %v3529_v1 }
  0xd2   : > { %3092 = vmatprep.mubr.msk.bf16.mxu0 %vm3531_vm2, %v3529_v1 }
  0xd8   : > { %3099 = vmatmul.mubr.msk.bf16.vlgmr.msra.gmra.mxu1 %vm373_vm4, %v3802_v33  ;;  %v1559_v33 = vrot.slane %v4041_v40, 2 }
  0xd9   : > { %3093 = vmatmul.mubr.msk.bf16.gmra.mxu0 %vm373_vm4, %v1154_v30  ;;  %3173 = vmatpush3.bf16.msra.mxu1 %v1852_v32  ;;  %v1329_v30 = vsel %vm1314_vm6, %v1326_v11, %v1328_v49 }
  0xda   : > { %3136 = vmatprep.mubr.msk.bf16.mxu0 %vm3531_vm2, %v3529_v1  ;;  %3102 = vmatprep.mubr.msk.bf16.mxu1 %vm3531_vm2, %v3529_v1  ;;  %v1560_v42 = vsel %vm1314_vm6, %v1557_v36, %v1559_v33  ;;  %v1562_v53 = vsel %vm1314_vm6, %v1559_v33, %v1561_v44 }
  0xe0   : > { %3103 = vmatmul.mubr.msk.bf16.gmra.mxu1 %vm373_vm4, %v3811_v37 }
  0xe1   : > { %3137 = vmatmul.mubr.msk.bf16.vlgmr.msra.gmra.mxu0 %vm373_vm4, %v1558_v17  ;;  %3106 = vmatprep.mubr.msk.bf16.mxu1 %vm3531_vm2, %v3529_v1 }
  0xe2   : > { %3211 = vmatpush3.bf16.msra.mxu0 %v2031_v39  ;;  %3140 = vmatprep.mubr.msk.bf16.mxu0 %vm3531_vm2, %v3529_v1  ;;  %v1330_v39 = vrot.slane %v3978_v3, 2 }
  0xe8   : > { %v4061_v45 = vpop.f32.mrf.mxu1  ;;  %3107 = vmatmul.mubr.msk.bf16.gmra.mxu1 %vm373_vm4, %v3831_v43  ;;  %v1563_v43 = vrot.slane %v4071_v54, 2 }
  0xe9   : > { %v4055_v35 = vpop.f32.mrf.mxu0  ;;  %3141 = vmatmul.mubr.msk.bf16.gmra.mxu0 %vm373_vm4, %v1560_v42  ;;  %3110 = vmatprep.mubr.msk.bf16.mxu1 %vm3531_vm2, %v3529_v1 }
  0xea   : > { %3144 = vmatprep.mubr.msk.bf16.mxu0 %vm3531_vm2, %v3529_v1  ;;  %v2930_v48 = vpop.f32.mrf.mxu1  ;;  %v1564_v62 = vsel %vm1314_vm6, %v1561_v44, %v1563_v43  ;;  %v1570_v44 = vsel %vm1314_vm6, %v1567_v46, %v1569_v59 }
  0xeb   : > { %v2910_v37 = vpop.f32.mrf.mxu0 }
  0xec   : > { %v4073_v15 = vpop.f32.mrf.mxu1  ;;  %v4155_v37 = vld [vmem:[%s3653_s30 + $0x50] sm:$0xff]  }
  0xed   : > { %v4067_v51 = vpop.f32.mrf.mxu0  ;;  %v1571_v3 = vrot.slane %v4155_v37, 2 }
  0xee   : > { %v2931_v57 = vpop.f32.mrf.mxu1 }
  0xef   : > { %v2911_v55 = vpop.f32.mrf.mxu0  ;;  %v1331_v57 = vsel %vm1314_vm6, %v1328_v49, %v1330_v39 }
  0xf0   : > { %v4081_v18 = vpop.f32.mrf.mxu1  ;;  %3111 = vmatmul.mubr.msk.bf16.gmra.mxu1 %vm373_vm4, %v3847_v47  ;;  %v1565_v47 = vrot.slane %v4091_v63, 2 }
  0xf1   : > { %v4075_v58 = vpop.f32.mrf.mxu0  ;;  %3145 = vmatmul.mubr.msk.bf16.gmra.mxu0 %vm373_vm4, %v1562_v53  ;;  %3114 = vmatprep.mubr.msk.bf16.mxu1 %vm3531_vm2, %v3529_v1 }
  0xf2   : > { %3148 = vmatprep.mubr.msk.bf16.mxu0 %vm3531_vm2, %v3529_v1  ;;  %v2934_v52 = vpop.f32.mrf.mxu1  ;;  %v1566_v16 = vsel %vm1314_vm6, %v1563_v43, %v1565_v47  ;;  %v1568_v25 = vsel %vm1314_vm6, %v1565_v47, %v1567_v46  ;;  %v1332_v47 = vrot.slane %v3991_v13, 2 }
  0xf3   : > { %v2914_v60 = vpop.f32.mrf.mxu0 }
  0xf4   : > { %v4093_v0 = vpop.f32.mrf.mxu1  ;;  %v1333_v13 = vsel %vm1314_vm6, %v1330_v39, %v1332_v47 }
  0xf5   : > { %v4087_v61 = vpop.f32.mrf.mxu0 }
  0xf6   : > { %v2935_v5 = vpop.f32.mrf.mxu1 }
  0xf7   : > { %v2915_v2 = vpop.f32.mrf.mxu0 }
  0xf8   : > { %v4101_v6 = vpop.f32.mrf.mxu1  ;;  %3115 = vmatmul.mubr.msk.bf16.gmra.mxu1 %vm373_vm4, %v3865_v14  ;;  %v1327_v14 = vsel %vm1314_vm6, %v1324_v50, %v1326_v11  ;;  %v1739_v2 = vshll.u32 %v4020_v31, 16  ;;  %v1747_v11 = vshll.u32 %v4023_v9, 16 }
  0xf9   : > { %v4095_v41 = vpop.f32.mrf.mxu0  ;;  %3149 = vmatmul.mubr.msk.bf16.gmra.mxu0 %vm373_vm4, %v1564_v62  ;;  %3118 = vmatprep.mubr.msk.bf16.mxu1 %vm3531_vm2, %v3529_v1 }
  0xfa   : > { %3152 = vmatprep.mubr.msk.bf16.mxu0 %vm3531_vm2, %v3529_v1  ;;  %v2938_v12 = vpop.f32.mrf.mxu1 }
  0xfb   : > { %v2918_v10 = vpop.f32.mrf.mxu0 }
  0xfc   : > { %v4114_v20 = vpop.f32.mrf.mxu1  ;;  %v1744_v10 = vshrl.u32 %v4023_v9, 16 }
  0xfd   : > { %v4108_v56 = vpop.f32.mrf.mxu0 }
  0xfe   : > { %v2939_v22 = vpop.f32.mrf.mxu1 }
  0xff   : > { %v2919_v21 = vpop.f32.mrf.mxu0  ;;  %v3360_v22 = vld [vmem:[%s3653_s30 + $0x58] ss:$0 sps:$4 sm:$0x33]  }
 0x100   : > { %v4125_v7 = vpop.f32.mrf.mxu1  ;;  %3119 = vmatmul.mubr.msk.bf16.gmra.mxu1 %vm373_vm4, %v1327_v14  ;;  %v1572_v14 = vsel %vm1314_vm6, %v1569_v59, %v1571_v3  ;;  %v1573_v59 = vrot.slane %v3360_v22, 2  ;;  %v1762_v22 = vshrl.u32 %v4053_v4, 16 }
 0x101   : > { %v4119_v23 = vpop.f32.mrf.mxu0  ;;  %3153 = vmatmul.mubr.msk.bf16.gmra.mxu0 %vm373_vm4, %v1566_v16  ;;  %3122 = vmatprep.mubr.msk.bf16.mxu1 %vm3531_vm2, %v3529_v1 }
 0x102   : > { %3156 = vmatprep.mubr.msk.bf16.mxu0 %vm3531_vm2, %v3529_v1  ;;  %v2942_v50 = vpop.f32.mrf.mxu1 }
 0x103   : > { %v2922_v24 = vpop.f32.mrf.mxu0  ;;  %v1746_v50 = vrot.slane %v1744_v10, 2 }
 0x104   : > { %v4137_v27 = vpop.f32.mrf.mxu1 }
 0x105   : > { %v4131_v8 = vpop.f32.mrf.mxu0 }
 0x106   : > { %v2943_v32 = vpop.f32.mrf.mxu1 }
 0x107   : > { %v2923_v29 = vpop.f32.mrf.mxu0 }
 0x108   : > { %v568_v36 = vpop.f32.mrf.mxu1  ;;  %3123 = vmatmul.mubr.msk.bf16.gmra.mxu1 %vm373_vm4, %v1329_v30 }
 0x109   : > { %v4140_v34 = vpop.f32.mrf.mxu0  ;;  %3157 = vmatmul.mubr.msk.bf16.gmra.mxu0 %vm373_vm4, %v1568_v25  ;;  %v569_v17 = vadd.f32 %v568_v36, %v4055_v35  ;;  %3126 = vmatprep.mubr.msk.bf16.mxu1 %vm3531_vm2, %v3529_v1  ;;  %v1749_v25 = vrot.slane %v1747_v11, 3 }
 0x10a   : > { %3160 = vmatprep.mubr.msk.bf16.mxu0 %vm3531_vm2, %v3529_v1  ;;  %v2948_v33 = vpop.f32.mrf.mxu1 }
 0x10b   : > { %v2926_v38 = vpop.f32.mrf.mxu0  ;;  %v1750_v33 = vor.u32 %v1749_v25, %v1746_v50  ;;  %v1764_v25 = vrot.slane %v1762_v22, 2 }
 0x10c   : > { %v571_v48 = vpop.f32.mrf.mxu1 }
 0x10d   : > { %v4151_v42 = vpop.f32.mrf.mxu0  ;;  %v572_v55 = vadd.f32 %v571_v48, %v4067_v51  ;;  %v1736_v51 = vshrl.u32 %v4020_v31, 16  ;;  %v1756_v48 = vshll.u32 %v4041_v40, 16 }
 0x10e   : > { %v2949_v43 = vpop.f32.mrf.mxu1 }
 0x10f   : > { %v2927_v53 = vpop.f32.mrf.mxu0  ;;  %v1738_v24 = vrot.slane %v1736_v51, 2  ;;  %v1574_v43 = vsel %vm1314_vm6, %v1571_v3, %v1573_v59 }
 0x110   : > { %v576_v52 = vpop.f32.mrf.mxu1  ;;  %3127 = vmatmul.mubr.msk.bf16.gmra.mxu1 %vm373_vm4, %v1331_v57 }
 0x111   : > { %v729_v35 = vpop.f32.mrf.mxu0  ;;  %3161 = vmatmul.mubr.msk.bf16.gmra.mxu0 %vm373_vm4, %v1570_v44  ;;  %v577_v5 = vadd.f32 %v576_v52, %v4075_v58  ;;  %3130 = vmatprep.mubr.msk.bf16.mxu1 %vm3531_vm2, %v3529_v1  ;;  %v1741_v58 = vrot.slane %v1739_v2, 3  ;;  %v1753_v44 = vshrl.u32 %v4041_v40, 16 }
 0x112   : > { %v4160_v60 = vadd.f32 %v729_v35, %v569_v17  ;;  %3164 = vmatprep.mubr.msk.bf16.mxu0 %vm3531_vm2, %v3529_v1  ;;  %v2952_v12 = vpop.f32.mrf.mxu1 }
 0x113   : > { %v2986_v62 = vpop.f32.mrf.mxu0  ;;  %v1742_v17 = vor.u32 %v1741_v58, %v1738_v24  ;;  %v1755_v2 = vrot.slane %v1753_v44, 2  ;;  %v1774_v44 = vshll.u32 %v4071_v54, 16 }
 0x114   : > { %v579_v46 = vpop.f32.mrf.mxu1 }
 0x115   : > { %v732_v16 = vpop.f32.mrf.mxu0  ;;  %v580_v49 = vadd.f32 %v579_v46, %v4087_v61  ;;  %v1977_v61 = vld [vmem:[%s3653_s30 + $0x10] sm:$0x8]  ;;  %v1751_v51 = vsel %vm1734_vm8, %v1742_v17, %v1750_v33  ;;  %v1765_v46 = vshll.u32 %v4053_v4, 16 }
 0x116   : > { %v4174_v21 = vadd.f32 %v732_v16, %v572_v55  ;;  %v2953_v29 = vpop.f32.mrf.mxu1  ;;  %v2745_v35 = vcombine.low %v1977_v61, %v4011_v28  ;;  %v1985_v28 = vrot.slane %v4023_v9, 3 }
 0x117   : > { %v2987_v31 = vpop.f32.mrf.mxu0  ;;  %v1767_v29 = vrot.slane %v1765_v46, 3 }
 0x118   : > { %v584_v36 = vpop.f32.mrf.mxu1  ;;  %3131 = vmatmul.mubr.msk.bf16.gmra.mxu1 %vm373_vm4, %v1333_v13  ;;  %v1984_v3 = vrot.slane %v2745_v35, 3 }
 0x119   : > { %v737_v30 = vpop.f32.mrf.mxu0  ;;  %3165 = vmatmul.mubr.msk.bf16.gmra.mxu0 %vm373_vm4, %v1572_v14  ;;  %v585_v39 = vadd.f32 %v584_v36, %v4095_v41  ;;  %3174 = vmatprep.mubr.msk.bf16.mxu1 %vm3531_vm2, %v3529_v1 }
 0x11a   : > { %v4181_v32 = vadd.f32 %v737_v30, %v577_v5  ;;  %3168 = vmatprep.mubr.msk.bf16.mxu0 %vm3531_vm2, %v3529_v1  ;;  %v2956_v53 = vpop.f32.mrf.mxu1  ;;  %v1758_v5 = vrot.slane %v1756_v48, 3  ;;  %v1986_v9 = vsel %vm1983_vm9, %v1984_v3, %v1985_v28 }
 0x11b   : > { %v2990_v38 = vpop.f32.mrf.mxu0 }
 0x11c   : > { %v587_v52 = vpop.f32.mrf.mxu1  ;;  %v1759_v14 = vor.u32 %v1758_v5, %v1755_v2  ;;  %v1987_v38 = vrot.slane %v4041_v40, 3 }
 0x11d   : > { %v740_v55 = vpop.f32.mrf.mxu0  ;;  %v588_v41 = vadd.f32 %v587_v52, %v4108_v56 }
 0x11e   : > { %v4192_v57 = vadd.f32 %v740_v55, %v580_v49  ;;  %v2957_v47 = vpop.f32.mrf.mxu1  ;;  %v1988_v40 = vsel %vm1983_vm9, %v1985_v28, %v1987_v38  ;;  %v1780_v28 = vshrl.u32 %v4091_v63, 16 }
 0x11f   : > { %v2991_v62 = vpop.f32.mrf.mxu0  ;;  %v1989_v47 = vrot.slane %v4053_v4, 3 }
 0x120   : > { %v592_v12 = vpop.f32.mrf.mxu1  ;;  %3175 = vmatmul.mubr.msk.bf16.vlgmr.msra.gmra.mxu1 %vm373_vm4, %v1751_v51 }
 0x121   : > { %v745_v10 = vpop.f32.mrf.mxu0  ;;  %3169 = vmatmul.mubr.msk.bf16.gmra.mxu0 %vm373_vm4, %v1574_v43  ;;  %v593_v16 = vadd.f32 %v592_v12, %v4119_v23  ;;  %3178 = vmatprep.mubr.msk.bf16.mxu1 %vm3531_vm2, %v3529_v1  ;;  %v1760_v23 = vsel %vm1734_vm8, %v1750_v33, %v1759_v14  ;;  %v1771_v33 = vshrl.u32 %v4071_v54, 16  ;;  %v1783_v12 = vshll.u32 %v4091_v63, 16 }
 0x122   : > { %v4199_v11 = vadd.f32 %v745_v10, %v585_v39  ;;  %3212 = vmatprep.mubr.msk.bf16.mxu0 %vm3531_vm2, %v3529_v1  ;;  %v2960_v31 = vpop.f32.mrf.mxu1  ;;  %v1768_v39 = vor.u32 %v1767_v29, %v1764_v25  ;;  %v1990_v22 = vsel %vm1983_vm9, %v1987_v38, %v1989_v47  ;;  %v1991_v25 = vrot.slane %v4071_v54, 3 }
 0x123   : > { %v2994_v56 = vpop.f32.mrf.mxu0  ;;  %v1773_v62 = vrot.slane %v1771_v33, 2  ;;  %v1789_v38 = vshrl.u32 %v4112_v19, 16 }
 0x124   : > { %v595_v49 = vpop.f32.mrf.mxu1  ;;  %v1992_v54 = vsel %vm1983_vm9, %v1989_v47, %v1991_v25  ;;  %v1801_v47 = vshll.u32 %v4135_v26, 16 }
 0x125   : > { %v748_v24 = vpop.f32.mrf.mxu0  ;;  %v596_v50 = vadd.f32 %v595_v49, %v4131_v8  ;;  %v1785_v49 = vrot.slane %v1783_v12, 3 }
 0x126   : > { %v4210_v58 = vadd.f32 %v748_v24, %v588_v41  ;;  %v2961_v30 = vpop.f32.mrf.mxu1  ;;  %v1776_v41 = vrot.slane %v1774_v44, 3 }
 0x127   : > { %v2995_v13 = vpop.f32.mrf.mxu0 }
 0x128   : > { %v600_v17 = vpop.f32.mrf.mxu1  ;;  %3179 = vmatmul.mubr.msk.bf16.gmra.mxu1 %vm373_vm4, %v1760_v23 }
 0x129   : > { %v753_v59 = vpop.f32.mrf.mxu0  ;;  %3213 = vmatmul.mubr.msk.bf16.vlgmr.msra.gmra.mxu0 %vm373_vm4, %v1986_v9  ;;  %v601_v8 = vadd.f32 %v600_v17, %v4140_v34  ;;  %3182 = vmatprep.mubr.msk.bf16.mxu1 %vm3531_vm2, %v3529_v1  ;;  %v1769_v34 = vsel %vm1734_vm8, %v1759_v14, %v1768_v39  ;;  %v1782_v9 = vrot.slane %v1780_v28, 2  ;;  %v1792_v17 = vshll.u32 %v4112_v19, 16 }
 0x12a   : > { %v4216_v36 = vadd.f32 %v753_v59, %v593_v16  ;;  %3216 = vmatprep.mubr.msk.bf16.mxu0 %vm3531_vm2, %v3529_v1  ;;  %v2964_v48 = vpop.f32.mrf.mxu1 }
 0x12b   : > { %v2998_v61 = vpop.f32.mrf.mxu0  ;;  %v1786_v59 = vor.u32 %v1785_v49, %v1782_v9 }
 0x12c   : > { %v603_v43 = vpop.f32.mrf.mxu1 }
 0x12d   : > { %v756_v53 = vpop.f32.mrf.mxu0  ;;  %v604_v52 = vadd.f32 %v603_v43, %v4151_v42  ;;  %v1777_v42 = vor.u32 %v1776_v41, %v1773_v62 }
 0x12e   : > { %v4227_v55 = vadd.f32 %v756_v53, %v596_v50  ;;  %v2965_v51 = vpop.f32.mrf.mxu1  ;;  %v1791_v53 = vrot.slane %v1789_v38, 2 }
 0x12f   : > { %v2999_v35 = vpop.f32.mrf.mxu0  ;;  %v1778_v24 = vsel %vm1734_vm8, %v1768_v39, %v1777_v42 }
 0x130   : > { %v608_v10 = vpop.f32.mrf.mxu1  ;;  %3183 = vmatmul.mubr.msk.bf16.gmra.mxu1 %vm373_vm4, %v1769_v34  ;;  %v1993_v34 = vrot.slane %v4091_v63, 3 }
 0x131   : > { %v761_v2 = vpop.f32.mrf.mxu0  ;;  %3217 = vmatmul.mubr.msk.bf16.gmra.mxu0 %vm373_vm4, %v1988_v40  ;;  %3186 = vmatprep.mubr.msk.bf16.mxu1 %vm3531_vm2, %v3529_v1  ;;  %v609_v31 = vadd.f32 %v608_v10, %v4061_v45  ;;  %v1794_v40 = vrot.slane %v1792_v17, 3 }
 0x132   : > { %v4233_v5 = vadd.f32 %v761_v2, %v601_v8  ;;  %3220 = vmatprep.mubr.msk.bf16.mxu0 %vm3531_vm2, %v3529_v1  ;;  %v2968_v56 = vpop.f32.mrf.mxu1  ;;  %v1798_v2 = vshrl.u32 %v4135_v26, 16  ;;  %v1994_v63 = vsel %vm1983_vm9, %v1991_v25, %v1993_v34 }
 0x133   : > { %v3002_v3 = vpop.f32.mrf.mxu0  ;;  %v1795_v51 = vor.u32 %v1794_v40, %v1791_v53 }
 0x134   : > { %v611_v46 = vpop.f32.mrf.mxu1 }
 0x135   : > { %v764_v16 = vpop.f32.mrf.mxu0  ;;  %v612_v45 = vadd.f32 %v611_v46, %v4073_v15  ;;  %v1787_v15 = vsel %vm1734_vm8, %v1777_v42, %v1786_v59 }
 0x136   : > { %v4243_v14 = vadd.f32 %v764_v16, %v604_v52  ;;  %v2969_v13 = vpop.f32.mrf.mxu1  ;;  %v1800_v16 = vrot.slane %v1798_v2, 2 }
 0x137   : > { %v3003_v4 = vpop.f32.mrf.mxu0  ;;  %v1810_v13 = vshll.u32 %v4155_v37, 16 }
 0x138   : > { %v616_v29 = vpop.f32.mrf.mxu1  ;;  %3187 = vmatmul.mubr.msk.bf16.gmra.mxu1 %vm373_vm4, %v1778_v24  ;;  %v1995_v24 = vrot.slane %v4112_v19, 3 }
 0x139   : > { %v769_v50 = vpop.f32.mrf.mxu0  ;;  %3221 = vmatmul.mubr.msk.bf16.gmra.mxu0 %vm373_vm4, %v1990_v22  ;;  %3190 = vmatprep.mubr.msk.bf16.mxu1 %vm3531_vm2, %v3529_v1  ;;  %v617_v48 = vadd.f32 %v616_v29, %v4081_v18  ;;  %v1803_v22 = vrot.slane %v1801_v47, 3 }
 0x13a   : > { %v4249_v23 = vadd.f32 %v769_v50, %v609_v31  ;;  %3224 = vmatprep.mubr.msk.bf16.mxu0 %vm3531_vm2, %v3529_v1  ;;  %v2972_v61 = vpop.f32.mrf.mxu1  ;;  %v1996_v19 = vsel %vm1983_vm9, %v1993_v34, %v1995_v24 }
 0x13b   : > { %v3006_v30 = vpop.f32.mrf.mxu0  ;;  %v1804_v25 = vor.u32 %v1803_v22, %v1800_v16  ;;  %v1812_v61 = vrot.slane %v1810_v13, 3 }
 0x13c   : > { %v619_v33 = vpop.f32.mrf.mxu1 }
 0x13d   : > { %v772_v8 = vpop.f32.mrf.mxu0  ;;  %v620_v18 = vadd.f32 %v619_v33, %v4093_v0  ;;  %v1796_v0 = vsel %vm1734_vm8, %v1786_v59, %v1795_v51  ;;  %v3362_v33 = vld [vmem:[%s3653_s30 + $0x58] ss:$0 sps:$4 sm:$0x77]   ;;  %s4716_s30 = scalar_lea.sflag [#allocation3], %s212_s13 }
 0x13e   : > { %v4260_v39 = vadd.f32 %v772_v8, %v612_v45  ;;  %v2973_v43 = vpop.f32.mrf.mxu1  ;;  %v1816_v34 = vshrl.u32 %v3362_v33, 16 }
 0x13f   : > { %v3007_v44 = vpop.f32.mrf.mxu0 }
 0x140   : > { %v624_v62 = vpop.f32.mrf.mxu1  ;;  %3191 = vmatmul.mubr.msk.bf16.gmra.mxu1 %vm373_vm4, %v1787_v15  ;;  %v1997_v15 = vrot.slane %v4135_v26, 3 }
 0x141   : > { %v777_v35 = vpop.f32.mrf.mxu0  ;;  %3225 = vmatmul.mubr.msk.bf16.gmra.mxu0 %vm373_vm4, %v1992_v54  ;;  %3194 = vmatprep.mubr.msk.bf16.mxu1 %vm3531_vm2, %v3529_v1  ;;  %v625_v56 = vadd.f32 %v624_v62, %v4101_v6  ;;  %v1807_v6 = vshrl.u32 %v4155_v37, 16  ;;  %v1805_v54 = vsel %vm1734_vm8, %v1795_v51, %v1804_v25  ;;  %v1819_v62 = vshll.u32 %v3362_v33, 16 }
 0x142   : > { %v4266_v52 = vadd.f32 %v777_v35, %v617_v48  ;;  %3228 = vmatprep.mubr.msk.bf16.mxu0 %vm3531_vm2, %v3529_v1  ;;  %v2976_v10 = vpop.f32.mrf.mxu1  ;;  %v1998_v26 = vsel %vm1983_vm9, %v1995_v24, %v1997_v15 }
 0x143   : > { %v3010_v41 = vpop.f32.mrf.mxu0  ;;  %v1809_v17 = vrot.slane %v1807_v6, 2 }
 0x144   : > { %v627_v28 = vpop.f32.mrf.mxu1 }
 0x145   : > { %v780_v3 = vpop.f32.mrf.mxu0  ;;  %v628_v50 = vadd.f32 %v627_v28, %v4114_v20  ;;  %v1813_v43 = vor.u32 %v1812_v61, %v1809_v17 }
 0x146   : > { %v4277_v42 = vadd.f32 %v780_v3, %v620_v18  ;;  %v2977_v46 = vpop.f32.mrf.mxu1 }
 0x147   : > { %v3011_v12 = vpop.f32.mrf.mxu0  ;;  %v1814_v3 = vsel %vm1734_vm8, %v1804_v25, %v1813_v43 }
 0x148   : > { %v632_v9 = vpop.f32.mrf.mxu1  ;;  %3195 = vmatmul.mubr.msk.bf16.gmra.mxu1 %vm373_vm4, %v1796_v0 }
 0x149   : > { %v785_v4 = vpop.f32.mrf.mxu0  ;;  %3229 = vmatmul.mubr.msk.bf16.gmra.mxu0 %vm373_vm4, %v1994_v63  ;;  %3198 = vmatprep.mubr.msk.bf16.mxu1 %vm3531_vm2, %v3529_v1  ;;  %v633_v8 = vadd.f32 %v632_v9, %v4125_v7  ;;  %v1821_v63 = vrot.slane %v1819_v62, 3 }
 0x14a   : > { %v4283_v31 = vadd.f32 %v785_v4, %v625_v56  ;;  %3232 = vmatprep.mubr.msk.bf16.mxu0 %vm3531_vm2, %v3529_v1  ;;  %v2980_v29 = vpop.f32.mrf.mxu1  ;;  %v1999_v56 = vrot.slane %v4155_v37, 3 }
 0x14b   : > { %v3014_v49 = vpop.f32.mrf.mxu0  ;;  %v2001_v29 = vrot.slane %v3362_v33, 3 }
 0x14c   : > { %v635_v59 = vpop.f32.mrf.mxu1  ;;  %v2000_v9 = vsel %vm1983_vm9, %v1997_v15, %v1999_v56 }
 0x14d   : > { %v788_v30 = vpop.f32.mrf.mxu0  ;;  %v636_v7 = vadd.f32 %v635_v59, %v4137_v27  ;;  %v1818_v27 = vrot.slane %v1816_v34, 2  ;;  %v2002_v61 = vsel %vm1983_vm9, %v1999_v56, %v2001_v29 }
 0x14e   : > { %v4294_v45 = vadd.f32 %v788_v30, %v628_v50  ;;  %v2981_v20 = vpop.f32.mrf.mxu1 }
 0x14f   : > { %v3015_v38 = vpop.f32.mrf.mxu0  ;;  %v1822_v22 = vor.u32 %v1821_v63, %v1818_v27 }
 0x150   : > { %v970_v53 = vpop.f32.mrf.mxu1  ;;  %3199 = vmatmul.mubr.msk.bf16.gmra.mxu1 %vm373_vm4, %v1805_v54 }
 0x151   : > { %v793_v44 = vpop.f32.mrf.mxu0  ;;  %3233 = vmatmul.mubr.msk.bf16.gmra.mxu0 %vm373_vm4, %v1996_v19  ;;  %v1041_v35 = vadd.f32 %v970_v53, %v4160_v60  ;;  %3202 = vmatprep.mubr.msk.bf16.mxu1 %vm3531_vm2, %v3529_v1  ;;  %v1823_v13 = vsel %vm1734_vm8, %v1813_v43, %v1822_v22 }
 0x152   : > { %v4301_v48 = vadd.f32 %v793_v44, %v633_v8  ;;  %3236 = vmatprep.mubr.msk.bf16.mxu0 %vm3531_vm2, %v3529_v1  ;;  %v3024_v41 = vpop.f32.mrf.mxu1 }
 0x153   : > { %v3018_v40 = vpop.f32.mrf.mxu0 }
 0x154   : > { %v973_v2 = vpop.f32.mrf.mxu1 }
 0x155   : > { %v796_v18 = vpop.f32.mrf.mxu0  ;;  %v1042_v10 = vadd.f32 %v973_v2, %v4174_v21 }
 0x156   : > { %v4311_v51 = vadd.f32 %v796_v18, %v636_v7  ;;  %v3025_v60 = vpop.f32.mrf.mxu1 }
 0x157   : > { %v3019_v47 = vpop.f32.mrf.mxu0 }
 0x158   : > { %v978_v0 = vpop.f32.mrf.mxu1  ;;  %3203 = vmatmul.mubr.msk.bf16.gmra.mxu1 %vm373_vm4, %v1814_v3 }
 0x159   : > { %v1219_v28 = vpop.f32.mrf.mxu0  ;;  %3237 = vmatmul.mubr.msk.bf16.gmra.mxu0 %vm373_vm4, %v1998_v26  ;;  %v1043_v21 = vadd.f32 %v978_v0, %v4181_v32  ;;  %3206 = vmatprep.mubr.msk.bf16.mxu1 %vm3531_vm2, %v3529_v1 }
 0x15a   : > { %v4317_v12 = vadd.f32 %v1219_v28, %v1041_v35  ;;  %3240 = vmatprep.mubr.msk.bf16.mxu0 %vm3531_vm2, %v3529_v1  ;;  %v3028_v46 = vpop.f32.mrf.mxu1 }
 0x15b   : > { %v3062_v16 = vpop.f32.mrf.mxu0 }
 0x15c   : > { %v981_v49 = vpop.f32.mrf.mxu1 }
 0x15d   : > { %v1222_v4 = vpop.f32.mrf.mxu0  ;;  %v1044_v37 = vadd.f32 %v981_v49, %v4192_v57 }
 0x15e   : > { %v4326_v24 = vadd.f32 %v1222_v4, %v1042_v10  ;;  %v3029_v50 = vpop.f32.mrf.mxu1 }
 0x15f   : > { %v3063_v6 = vpop.f32.mrf.mxu0 }
 0x160   : > { %v986_v30 = vpop.f32.mrf.mxu1  ;;  %3207 = vmatmul.mubr.msk.bf16.gmra.mxu1 %vm373_vm4, %v1823_v13 }
 0x161   : > { %v1227_v25 = vpop.f32.mrf.mxu0  ;;  %3241 = vmatmul.mubr.msk.bf16.gmra.mxu0 %vm373_vm4, %v2000_v9  ;;  %v1045_v59 = vadd.f32 %v986_v30, %v4199_v11 }
 0x162   : > { %v4332_v32 = vadd.f32 %v1227_v25, %v1043_v21  ;;  %3244 = vmatprep.mubr.msk.bf16.mxu0 %vm3531_vm2, %v3529_v1  ;;  %v3032_v38 = vpop.f32.mrf.mxu1 }
 0x163   : > { %v3066_v19 = vpop.f32.mrf.mxu0 }
 0x164   : > { %v989_v8 = vpop.f32.mrf.mxu1 }
 0x165   : > { %v1230_v57 = vpop.f32.mrf.mxu0  ;;  %v1046_v20 = vadd.f32 %v989_v8, %v4210_v58 }
 0x166   : > { %v4338_v17 = vadd.f32 %v1230_v57, %v1044_v37  ;;  %v3033_v44 = vpop.f32.mrf.mxu1 }
 0x167   : > { %v3067_v54 = vpop.f32.mrf.mxu0 }
 0x168   : > { %v994_v33 = vpop.f32.mrf.mxu1 }
 0x169   : > { %v1235_v15 = vpop.f32.mrf.mxu0  ;;  %3245 = vmatmul.mubr.msk.bf16.gmra.mxu0 %vm373_vm4, %v2002_v61  ;;  %v1047_v11 = vadd.f32 %v994_v33, %v4216_v36 }
 0x16a   : > { %v4343_v1 = vadd.f32 %v1235_v15, %v1045_v59  ;;  %v3036_v40 = vpop.f32.mrf.mxu1 }
 0x16b   : > { %v3070_v53 = vpop.f32.mrf.mxu0 }
 0x16c   : > { %v997_v35 = vpop.f32.mrf.mxu1 }
 0x16d   : > { %v1238_v43 = vpop.f32.mrf.mxu0  ;;  %v1048_v62 = vadd.f32 %v997_v35, %v4227_v55 }
 0x16e   : > { %v4346_v7 = vadd.f32 %v1238_v43, %v1046_v20  ;;  %v3037_v41 = vpop.f32.mrf.mxu1 }
 0x16f   : > { %v3071_v34 = vpop.f32.mrf.mxu0 }
 0x170   : > { %v1002_v26 = vpop.f32.mrf.mxu1 }
 0x171   : > { %v1243_v58 = vpop.f32.mrf.mxu0  ;;  %v1049_v47 = vadd.f32 %v1002_v26, %v4233_v5 }
 0x172   : > { %v4349_v18 = vadd.f32 %v1243_v58, %v1047_v11  ;;  %v3040_v10 = vpop.f32.mrf.mxu1 }
 0x173   : > { %v3074_v2 = vpop.f32.mrf.mxu0 }
 0x174   : > { %v1005_v36 = vpop.f32.mrf.mxu1 }
 0x175   : > { %v1246_v3 = vpop.f32.mrf.mxu0  ;;  %v1050_v60 = vadd.f32 %v1005_v36, %v4243_v14 }
 0x176   : > { %v4352_v27 = vadd.f32 %v1246_v3, %v1048_v62  ;;  %v3041_v28 = vpop.f32.mrf.mxu1 }
 0x177   : > { %v3075_v63 = vpop.f32.mrf.mxu0 }
 0x178   : > { %v1010_v55 = vpop.f32.mrf.mxu1 }
 0x179   : > { %v1251_v56 = vpop.f32.mrf.mxu0  ;;  %v1051_v21 = vadd.f32 %v1010_v55, %v4249_v23 }
 0x17a   : > { %v4355_v0 = vadd.f32 %v1251_v56, %v1049_v47  ;;  %v3044_v22 = vpop.f32.mrf.mxu1 }
 0x17b   : > { %v3078_v16 = vpop.f32.mrf.mxu0 }
 0x17c   : > { %v1013_v5 = vpop.f32.mrf.mxu1 }
 0x17d   : > { %v1254_v46 = vpop.f32.mrf.mxu0  ;;  %v1052_v49 = vadd.f32 %v1013_v5, %v4260_v39 }
 0x17e   : > { %v4358_v4 = vadd.f32 %v1254_v46, %v1050_v60  ;;  %v3045_v6 = vpop.f32.mrf.mxu1 }
 0x17f   : > { %v3079_v9 = vpop.f32.mrf.mxu0 }
 0x180   : > { %v1018_v14 = vpop.f32.mrf.mxu1 }
 0x181   : > { %v1259_v37 = vpop.f32.mrf.mxu0  ;;  %v1053_v25 = vadd.f32 %v1018_v14, %v4266_v52 }
 0x182   : > { %v4361_v13 = vadd.f32 %v1259_v37, %v1051_v21  ;;  %v3048_v29 = vpop.f32.mrf.mxu1 }
 0x183   : > { %v3082_v50 = vpop.f32.mrf.mxu0 }
 0x184   : > { %v1021_v23 = vpop.f32.mrf.mxu1 }
 0x185   : > { %v1262_v30 = vpop.f32.mrf.mxu0  ;;  %v1054_v38 = vadd.f32 %v1021_v23, %v4277_v42 }
 0x186   : > { %v4364_v19 = vadd.f32 %v1262_v30, %v1052_v49  ;;  %v3049_v57 = vpop.f32.mrf.mxu1 }
 0x187   : > { %v3083_v59 = vpop.f32.mrf.mxu0 }
 0x188   : > { %v1026_v39 = vpop.f32.mrf.mxu1 }
 0x189   : > { %v1267_v61 = vpop.f32.mrf.mxu0  ;;  %v1055_v20 = vadd.f32 %v1026_v39, %v4283_v31 }
 0x18a   : > { %v4367_v8 = vadd.f32 %v1267_v61, %v1053_v25  ;;  %v3052_v44 = vpop.f32.mrf.mxu1 }
 0x18b   : > { %v3086_v54 = vpop.f32.mrf.mxu0 }
 0x18c   : > { %v1029_v52 = vpop.f32.mrf.mxu1 }
 0x18d   : > { %v1270_v15 = vpop.f32.mrf.mxu0  ;;  %v1056_v11 = vadd.f32 %v1029_v52, %v4294_v45 }
 0x18e   : > { %v4370_v33 = vadd.f32 %v1270_v15, %v1054_v38  ;;  %v3053_v40 = vpop.f32.mrf.mxu1 }
 0x18f   : > { %v3087_v53 = vpop.f32.mrf.mxu0 }
 0x190   : > { %v1034_v42 = vpop.f32.mrf.mxu1 }
 0x191   : > { %v1275_v43 = vpop.f32.mrf.mxu0  ;;  %v1057_v62 = vadd.f32 %v1034_v42, %v4301_v48 }
 0x192   : > { %v4373_v35 = vadd.f32 %v1275_v43, %v1055_v20  ;;  %v3056_v41 = vpop.f32.mrf.mxu1 }
 0x193   : > { %v3090_v34 = vpop.f32.mrf.mxu0 }
 0x194   : > { %v1037_v31 = vpop.f32.mrf.mxu1 }
 0x195   : > { %v1278_v58 = vpop.f32.mrf.mxu0  ;;  %v1058_v47 = vadd.f32 %v1037_v31, %v4311_v51 }
 0x196   : > { %v4376_v26 = vadd.f32 %v1278_v58, %v1056_v11  ;;  %v3057_v10 = vpop.f32.mrf.mxu1 }
 0x197   : > { %v3091_v2 = vpop.f32.mrf.mxu0 }
 0x198   : > { %v1398_v45 = vpop.f32.mrf.mxu1 }
 0x199   : > { %v1283_v3 = vpop.f32.mrf.mxu0  ;;  %v1469_v60 = vadd.f32 %v1398_v45, %v4317_v12 }
 0x19a   : > { %v4379_v36 = vadd.f32 %v1283_v3, %v1057_v62  ;;  %v3100_v28 = vpop.f32.mrf.mxu1 }
 0x19b   : > { %v3094_v63 = vpop.f32.mrf.mxu0 }
 0x19c   : > { %v1401_v48 = vpop.f32.mrf.mxu1 }
 0x19d   : > { %v1286_v56 = vpop.f32.mrf.mxu0  ;;  %v1470_v21 = vadd.f32 %v1401_v48, %v4326_v24 }
 0x19e   : > { %v4382_v55 = vadd.f32 %v1286_v56, %v1058_v47  ;;  %v3101_v22 = vpop.f32.mrf.mxu1 }
 0x19f   : > { %v3095_v16 = vpop.f32.mrf.mxu0 }
 0x1a0   : > { %v1406_v51 = vpop.f32.mrf.mxu1 }
 0x1a1   : > { %v1639_v46 = vpop.f32.mrf.mxu0  ;;  %v1471_v49 = vadd.f32 %v1406_v51, %v4332_v32 }
 0x1a2   : > { %v4385_v5 = vadd.f32 %v1639_v46, %v1469_v60  ;;  %v3104_v6 = vpop.f32.mrf.mxu1 }
 0x1a3   : > { %v3138_v9 = vpop.f32.mrf.mxu0 }
 0x1a4   : > { %v1409_v12 = vpop.f32.mrf.mxu1 }
 0x1a5   : > { %v1642_v37 = vpop.f32.mrf.mxu0  ;;  %v1472_v25 = vadd.f32 %v1409_v12, %v4338_v17 }
 0x1a6   : > { %v4388_v14 = vadd.f32 %v1642_v37, %v1470_v21  ;;  %v3105_v29 = vpop.f32.mrf.mxu1 }
 0x1a7   : > { %v3139_v50 = vpop.f32.mrf.mxu0 }
 0x1a8   : > { %v1414_v24 = vpop.f32.mrf.mxu1 }
 0x1a9   : > { %v1647_v30 = vpop.f32.mrf.mxu0  ;;  %v1473_v38 = vadd.f32 %v1414_v24, %v4343_v1 }
 0x1aa   : > { %v4391_v23 = vadd.f32 %v1647_v30, %v1471_v49  ;;  %v3108_v57 = vpop.f32.mrf.mxu1 }
 0x1ab   : > { %v3142_v59 = vpop.f32.mrf.mxu0 }
 0x1ac   : > { %v1417_v32 = vpop.f32.mrf.mxu1 }
 0x1ad   : > { %v1650_v61 = vpop.f32.mrf.mxu0  ;;  %v1474_v20 = vadd.f32 %v1417_v32, %v4346_v7 }
 0x1ae   : > { %v4394_v39 = vadd.f32 %v1650_v61, %v1472_v25  ;;  %v3109_v44 = vpop.f32.mrf.mxu1 }
 0x1af   : > { %v3143_v54 = vpop.f32.mrf.mxu0 }
 0x1b0   : > { %v1422_v17 = vpop.f32.mrf.mxu1 }
 0x1b1   : > { %v1655_v15 = vpop.f32.mrf.mxu0  ;;  %v1475_v11 = vadd.f32 %v1422_v17, %v4349_v18 }
 0x1b2   : > { %v4397_v52 = vadd.f32 %v1655_v15, %v1473_v38  ;;  %v3112_v40 = vpop.f32.mrf.mxu1 }
 0x1b3   : > { %v3146_v53 = vpop.f32.mrf.mxu0 }
 0x1b4   : > { %v1425_v1 = vpop.f32.mrf.mxu1 }
 0x1b5   : > { %v1658_v43 = vpop.f32.mrf.mxu0  ;;  %v1476_v62 = vadd.f32 %v1425_v1, %v4352_v27 }
 0x1b6   : > { %v4400_v42 = vadd.f32 %v1658_v43, %v1474_v20  ;;  %v3113_v41 = vpop.f32.mrf.mxu1 }
 0x1b7   : > { %v3147_v34 = vpop.f32.mrf.mxu0 }
 0x1b8   : > { %v1430_v7 = vpop.f32.mrf.mxu1 }
 0x1b9   : > { %v1663_v58 = vpop.f32.mrf.mxu0  ;;  %v1477_v47 = vadd.f32 %v1430_v7, %v4355_v0 }
 0x1ba   : > { %v4403_v31 = vadd.f32 %v1663_v58, %v1475_v11  ;;  %v3116_v10 = vpop.f32.mrf.mxu1 }
 0x1bb   : > { %v3150_v2 = vpop.f32.mrf.mxu0 }
 0x1bc   : > { %v1433_v18 = vpop.f32.mrf.mxu1 }
 0x1bd   : > { %v1666_v3 = vpop.f32.mrf.mxu0  ;;  %v1478_v60 = vadd.f32 %v1433_v18, %v4358_v4 }
 0x1be   : > { %v4406_v45 = vadd.f32 %v1666_v3, %v1476_v62  ;;  %v3117_v28 = vpop.f32.mrf.mxu1 }
 0x1bf   : > { %v3151_v63 = vpop.f32.mrf.mxu0 }
 0x1c0   : > { %v1438_v27 = vpop.f32.mrf.mxu1 }
 0x1c1   : > { %v1671_v56 = vpop.f32.mrf.mxu0  ;;  %v1479_v21 = vadd.f32 %v1438_v27, %v4361_v13 }
 0x1c2   : > { %v4409_v48 = vadd.f32 %v1671_v56, %v1477_v47  ;;  %v3120_v22 = vpop.f32.mrf.mxu1 }
 0x1c3   : > { %v3154_v16 = vpop.f32.mrf.mxu0 }
 0x1c4   : > { %v1441_v0 = vpop.f32.mrf.mxu1 }
 0x1c5   : > { %v1674_v46 = vpop.f32.mrf.mxu0  ;;  %v1480_v49 = vadd.f32 %v1441_v0, %v4364_v19 }
 0x1c6   : > { %v4412_v51 = vadd.f32 %v1674_v46, %v1478_v60  ;;  %v3121_v6 = vpop.f32.mrf.mxu1 }
 0x1c7   : > { %v3155_v9 = vpop.f32.mrf.mxu0 }
 0x1c8   : > { %v1446_v4 = vpop.f32.mrf.mxu1 }
 0x1c9   : > { %v1679_v37 = vpop.f32.mrf.mxu0  ;;  %v1481_v25 = vadd.f32 %v1446_v4, %v4367_v8 }
 0x1ca   : > { %v4415_v12 = vadd.f32 %v1679_v37, %v1479_v21  ;;  %v3124_v29 = vpop.f32.mrf.mxu1 }
 0x1cb   : > { %v3158_v50 = vpop.f32.mrf.mxu0 }
 0x1cc   : > { %v1449_v13 = vpop.f32.mrf.mxu1 }
 0x1cd   : > { %v1682_v30 = vpop.f32.mrf.mxu0  ;;  %v1482_v38 = vadd.f32 %v1449_v13, %v4370_v33 }
 0x1ce   : > { %v4418_v24 = vadd.f32 %v1682_v30, %v1480_v49  ;;  %v3125_v57 = vpop.f32.mrf.mxu1 }
 0x1cf   : > { %v3159_v59 = vpop.f32.mrf.mxu0 }
 0x1d0   : > { %v1454_v19 = vpop.f32.mrf.mxu1 }
 0x1d1   : > { %v1687_v61 = vpop.f32.mrf.mxu0  ;;  %v1483_v20 = vadd.f32 %v1454_v19, %v4373_v35 }
 0x1d2   : > { %v4421_v32 = vadd.f32 %v1687_v61, %v1481_v25  ;;  %v3128_v44 = vpop.f32.mrf.mxu1 }
 0x1d3   : > { %v3162_v54 = vpop.f32.mrf.mxu0 }
 0x1d4   : > { %v1457_v8 = vpop.f32.mrf.mxu1 }
 0x1d5   : > { %v1690_v15 = vpop.f32.mrf.mxu0  ;;  %v1484_v11 = vadd.f32 %v1457_v8, %v4376_v26 }
 0x1d6   : > { %v4424_v17 = vadd.f32 %v1690_v15, %v1482_v38  ;;  %v3129_v40 = vpop.f32.mrf.mxu1 }
 0x1d7   : > { %v3163_v53 = vpop.f32.mrf.mxu0 }
 0x1d8   : > { %v1462_v33 = vpop.f32.mrf.mxu1 }
 0x1d9   : > { %v1695_v43 = vpop.f32.mrf.mxu0  ;;  %v1485_v62 = vadd.f32 %v1462_v33, %v4379_v36 }
 0x1da   : > { %v4427_v1 = vadd.f32 %v1695_v43, %v1483_v20  ;;  %v3132_v41 = vpop.f32.mrf.mxu1 }
 0x1db   : > { %v3166_v34 = vpop.f32.mrf.mxu0 }
 0x1dc   : > { %v1465_v35 = vpop.f32.mrf.mxu1 }
 0x1dd   : > { %v1698_v58 = vpop.f32.mrf.mxu0  ;;  %v1486_v47 = vadd.f32 %v1465_v35, %v4382_v55  ;;  %v4441_v55 = vld [vmem:[%s4769_s2] ss:$0 sm:$0xff] }
 0x1de   : > { %v4430_v7 = vadd.f32 %v1698_v58, %v1484_v11  ;;  %v3133_v10 = vpop.f32.mrf.mxu1 }
 0x1df   : > { %v3167_v2 = vpop.f32.mrf.mxu0 }
 0x1e0   : > { %v1888_v26 = vpop.f32.mrf.mxu1 }
 0x1e1   : > { %v1703_v3 = vpop.f32.mrf.mxu0  ;;  %v1959_v16 = vadd.f32 %v1888_v26, %v4385_v5  ;;  %v4448_v5 = vld [vmem:[%s4770_s3] ss:$0 sm:$0xff] }
 0x1e2   : > { %v4433_v18 = vadd.f32 %v1703_v3, %v1485_v62  ;;  %v3176_v60 = vpop.f32.mrf.mxu1 }
 0x1e3   : > { %v3170_v63 = vpop.f32.mrf.mxu0 }
 0x1e4   : > { %v1891_v27 = vpop.f32.mrf.mxu1 }
 0x1e5   : > { %v1706_v28 = vpop.f32.mrf.mxu0  ;;  %v1960_v49 = vadd.f32 %v1891_v27, %v4388_v14 }
 0x1e6   : > { %v4435_v56 = vadd.f32 %v1706_v28, %v1486_v47  ;;  %v3177_v21 = vpop.f32.mrf.mxu1 }
 0x1e7   : > { %v3171_v36 = vpop.f32.mrf.mxu0 }
 0x1e8   : > { %v1896_v0 = vpop.f32.mrf.mxu1 }
 0x1e9   : > { %v2067_v22 = vpop.f32.mrf.mxu0  ;;  %v1961_v13 = vadd.f32 %v1896_v0, %v4391_v23 }
 0x1ea   : > { %v2138_v46 = vadd.f32 %v2067_v22, %v1959_v16  ;;  %v3180_v37 = vpop.f32.mrf.mxu1 }
 0x1eb   : > { %v3214_v9 = vpop.f32.mrf.mxu0 }
 0x1ec   : > { %v2163_v6 = vadd.f32 %v4441_v55, %v2138_v46  ;;  %v1899_v29 = vpop.f32.mrf.mxu1 }
 0x1ed   : > { %v2070_v4 = vpop.f32.mrf.mxu0  ;;  %v1962_v44 = vadd.f32 %v1899_v29, %v4394_v39 }
 0x1ee   : > { %v2181_v50 = vmax.f32 %v2163_v6, 0.0  ;;  %v2139_v25 = vadd.f32 %v2070_v4, %v1960_v49  ;;  %v3181_v14 = vpop.f32.mrf.mxu1 }
 0x1ef   : > { %v3215_v30 = vpop.f32.mrf.mxu0 }
 0x1f0   : > { %v2164_v59 = vadd.f32 %v4441_v55, %v2139_v25  ;;  %v4453_v38 = vadd.f32 %v4448_v5, %v2181_v50  ;;  %v1904_v54 = vpop.f32.mrf.mxu1 }
 0x1f1   : > { %v2075_v57 = vpop.f32.mrf.mxu0  ;;  %v1963_v34 = vadd.f32 %v1904_v54, %v4397_v52 }
 0x1f2   : > { %v2182_v61 = vmax.f32 %v2164_v59, 0.0  ;;  %v2140_v19 = vadd.f32 %v2075_v57, %v1961_v13  ;;  %2224 = vmax.xlane.f32.xlu0 %v4453_v38  ;;  %v3184_v23 = vpop.f32.mrf.mxu1 }
 0x1f3   : > { %v3218_v20 = vpop.f32.mrf.mxu0 }
 0x1f4   : > { %v2165_v15 = vadd.f32 %v4441_v55, %v2140_v19  ;;  %v4459_v8 = vadd.f32 %v4448_v5, %v2182_v61  ;;  %v1907_v43 = vpop.f32.mrf.mxu1 }
 0x1f5   : > { %v2078_v53 = vpop.f32.mrf.mxu0  ;;  %v1964_v3 = vadd.f32 %v1907_v43, %v4400_v42 }
 0x1f6   : > { %v2183_v11 = vmax.f32 %v2165_v15, 0.0  ;;  %v2141_v40 = vadd.f32 %v2078_v53, %v1962_v44  ;;  %2226 = vmax.xlane.f32.xlu1 %v4459_v8  ;;  %v3185_v39 = vpop.f32.mrf.mxu1 }
 0x1f7   : > { %v3219_v33 = vpop.f32.mrf.mxu0 }
 0x1f8   : > { %v2166_v62 = vadd.f32 %v4441_v55, %v2141_v40  ;;  %v4465_v41 = vadd.f32 %v4448_v5, %v2183_v11  ;;  %v1912_v47 = vpop.f32.mrf.mxu1 }
 0x1f9   : > { %v2083_v58 = vpop.f32.mrf.mxu0  ;;  %v1965_v21 = vadd.f32 %v1912_v47, %v4403_v31 }
 0x1fa   : > { %v2184_v35 = vmax.f32 %v2166_v62, 0.0  ;;  %v2142_v2 = vadd.f32 %v2083_v58, %v1963_v34  ;;  %2228 = vmax.xlane.f32.xlu0 %v4465_v41  ;;  %v3188_v52 = vpop.f32.mrf.mxu1 }
 0x1fb   : > { %v3222_v10 = vpop.f32.mrf.mxu0 }
 0x1fc   : > { %v2167_v26 = vadd.f32 %v4441_v55, %v2142_v2  ;;  %v4471_v63 = vadd.f32 %v4448_v5, %v2184_v35  ;;  %v1915_v36 = vpop.f32.mrf.mxu1 }
 0x1fd   : > { %v2086_v60 = vpop.f32.mrf.mxu0  ;;  %v1966_v4 = vadd.f32 %v1915_v36, %v4406_v45 }
 0x1fe   : > { %v2185_v28 = vmax.f32 %v2167_v26, 0.0  ;;  %v2143_v27 = vadd.f32 %v2086_v60, %v1964_v3  ;;  %2230 = vmax.xlane.f32.xlu0 %v4471_v63  ;;  %v3189_v42 = vpop.f32.mrf.mxu1 }
 0x1ff   : > { %v3223_v16 = vpop.f32.mrf.mxu0 }
 0x200   : > { %v2168_v22 = vadd.f32 %v4441_v55, %v2143_v27  ;;  %v4477_v46 = vadd.f32 %v4448_v5, %v2185_v28  ;;  %v1920_v6 = vpop.f32.mrf.mxu1 }
 0x201   : > { %v2091_v0 = vpop.f32.mrf.mxu0  ;;  %v1967_v57 = vadd.f32 %v1920_v6, %v4409_v48 }
 0x202   : > { %v2186_v9 = vmax.f32 %v2168_v22, 0.0  ;;  %v2144_v49 = vadd.f32 %v2091_v0, %v1965_v21  ;;  %2232 = vmax.xlane.f32.xlu1 %v4477_v46  ;;  %v3192_v31 = vpop.f32.mrf.mxu1 }
 0x203   : > { %v3226_v37 = vpop.f32.mrf.mxu0 }
 0x204   : > { %v2169_v50 = vadd.f32 %v4441_v55, %v2144_v49  ;;  %v4483_v25 = vadd.f32 %v4448_v5, %v2186_v9  ;;  %v1923_v59 = vpop.f32.mrf.mxu1 }
 0x205   : > { %v2094_v29 = vpop.f32.mrf.mxu0 }
 0x206   : > { %v2187_v30 = vmax.f32 %v2169_v50, 0.0  ;;  %v2145_v13 = vadd.f32 %v2094_v29, %v1966_v4  ;;  %2234 = vmax.xlane.f32.xlu0 %v4483_v25  ;;  %v3193_v45 = vpop.f32.mrf.mxu1 }
 0x207   : > { %v3227_v14 = vpop.f32.mrf.mxu0 }
 0x208   : > { %v2170_v61 = vadd.f32 %v4441_v55, %v2145_v13  ;;  %v4489_v19 = vadd.f32 %v4448_v5, %v2187_v30  ;;  %v4492_v15 = vpop.f32.mrf.mxu1 }
 0x209   : > { %v2099_v54 = vpop.f32.mrf.mxu0 }
 0x20a   : > { %v2188_v20 = vmax.f32 %v2170_v61, 0.0  ;;  %v2146_v44 = vadd.f32 %v2099_v54, %v1967_v57  ;;  %2236 = vmax.xlane.f32.xlu0 %v4489_v19  ;;  %v3196_v48 = vpop.f32.mrf.mxu1 }
 0x20b   : > { %v3230_v23 = vpop.f32.mrf.mxu0 }
 0x20c   : > { %v2171_v53 = vadd.f32 %v4441_v55, %v2146_v44  ;;  %v4496_v11 = vadd.f32 %v4448_v5, %v2188_v20  ;;  %v1931_v33 = vpop.f32.mrf.mxu1 }
 0x20d   : > { %v2102_v40 = vpop.f32.mrf.mxu0  ;;  %v1970_v47 = vadd.f32 %v1931_v33, %v4418_v24 }
 0x20e   : > { %v2189_v43 = vmax.f32 %v2171_v53, 0.0  ;;  %2238 = vmax.xlane.f32.xlu1 %v4496_v11  ;;  %v3197_v39 = vpop.f32.mrf.mxu1 }
 0x20f   : > { %v3231_v34 = vpop.f32.mrf.mxu0 }
 0x210   : > { %v4500_v62 = vadd.f32 %v4448_v5, %v2189_v43  ;;  %v1936_v35 = vpop.f32.mrf.mxu1 }
 0x211   : > { %v2107_v58 = vpop.f32.mrf.mxu0  ;;  %v1971_v28 = vadd.f32 %v1936_v35, %v4421_v32 }
 0x212   : > { %2240 = vmax.xlane.f32.xlu1 %v4500_v62  ;;  %v3200_v10 = vpop.f32.mrf.mxu1 }
 0x213   : > { %v3234_v2 = vpop.f32.mrf.mxu0  ;;  %v1969_v10 = vadd.f32 %v4492_v15, %v4415_v12 }
 0x214   : > { %v1939_v52 = vpop.f32.mrf.mxu1 }
 0x215   : > { %v2110_v3 = vpop.f32.mrf.mxu0  ;;  %v1972_v9 = vadd.f32 %v1939_v52, %v4424_v17  ;;  %v1968_v17 = vadd.f32 %v1923_v59, %v4412_v51 }
 0x216   : > { %v2149_v26 = vadd.f32 %v2110_v3, %v1970_v47  ;;  %v3201_v36 = vpop.f32.mrf.mxu1 }
 0x217   : > { %v3235_v60 = vpop.f32.mrf.mxu0  ;;  %v2147_v54 = vadd.f32 %v2102_v40, %v1968_v17 }
 0x218   : > { %v2174_v27 = vadd.f32 %v4441_v55, %v2149_v26  ;;  %v1944_v42 = vpop.f32.mrf.mxu1 }
 0x219   : > { %v2115_v16 = vpop.f32.mrf.mxu0  ;;  %v1973_v29 = vadd.f32 %v1944_v42, %v4427_v1  ;;  %v2172_v59 = vadd.f32 %v4441_v55, %v2147_v54 }
 0x21a   : > { %v2192_v21 = vmax.f32 %v2174_v27, 0.0  ;;  %v2150_v22 = vadd.f32 %v2115_v16, %v1971_v28  ;;  %v3204_v6 = vpop.f32.mrf.mxu1  ;;  %v2148_v28 = vadd.f32 %v2107_v58, %v1969_v10 }
 0x21b   : > { %v3238_v0 = vpop.f32.mrf.mxu0  ;;  %v2190_v52 = vmax.f32 %v2172_v59, 0.0 }
 0x21c   : > { %v2175_v49 = vadd.f32 %v4441_v55, %v2150_v22  ;;  %v4509_v24 = vadd.f32 %v4448_v5, %v2192_v21  ;;  %v1947_v32 = vpop.f32.mrf.mxu1  ;;  %v2173_v15 = vadd.f32 %v4441_v55, %v2148_v28 }
 0x21d   : > { %v2118_v37 = vpop.f32.mrf.mxu0  ;;  %v1974_v23 = vadd.f32 %v1947_v32, %v4430_v7  ;;  %v4543_v0 = vadd.f32 %v4448_v5, %v2190_v52 }
 0x21e   : > { %v2193_v4 = vmax.f32 %v2175_v49, 0.0  ;;  %v2151_v50 = vadd.f32 %v2118_v37, %v1972_v9  ;;  %2246 = vmax.xlane.f32.xlu0 %v4509_v24  ;;  %v3205_v14 = vpop.f32.mrf.mxu1  ;;  %v2191_v9 = vmax.f32 %v2173_v15, 0.0 }
 0x21f   : > { %v3239_v31 = vpop.f32.mrf.mxu0 }
 0x220   : > { %v2176_v30 = vadd.f32 %v4441_v55, %v2151_v50  ;;  %v4515_v13 = vadd.f32 %v4448_v5, %v2193_v4  ;;  %v1952_v20 = vpop.f32.mrf.mxu1  ;;  %v4555_v6 = vadd.f32 %v4448_v5, %v2191_v9 }
 0x221   : > { %v2123_v57 = vpop.f32.mrf.mxu0  ;;  %v1975_v40 = vadd.f32 %v1952_v20, %v4433_v18 }
 0x222   : > { %v2194_v61 = vmax.f32 %v2176_v30, 0.0  ;;  %v2152_v45 = vadd.f32 %v2123_v57, %v1973_v29  ;;  %2248 = vmax.xlane.f32.xlu1 %v4515_v13  ;;  %v3208_v48 = vpop.f32.mrf.mxu1 }
 0x223   : > { %v3242_v44 = vpop.f32.mrf.mxu0 }
 0x224   : > { %v2177_v1 = vadd.f32 %v4441_v55, %v2152_v45  ;;  %v4522_v53 = vadd.f32 %v4448_v5, %v2194_v61  ;;  %v1955_v34 = vpop.f32.mrf.mxu1 }
 0x225   : > { %v2126_v43 = vpop.f32.mrf.mxu0  ;;  %v1976_v27 = vadd.f32 %v1955_v34, %v4435_v56 }
 0x226   : > { %v2195_v33 = vmax.f32 %v2177_v1, 0.0  ;;  %v2153_v51 = vadd.f32 %v2126_v43, %v1974_v23  ;;  %2250 = vmax.xlane.f32.xlu1 %v4522_v53  ;;  %v3209_v2 = vpop.f32.mrf.mxu1 }
 0x227   : > { %v3243_v39 = vpop.f32.mrf.mxu0 }
 0x228   : > { %v2178_v35 = vadd.f32 %v4441_v55, %v2153_v51  ;;  %v4529_v7 = vadd.f32 %v4448_v5, %v2195_v33 }
 0x229   : > { %v2131_v47 = vpop.f32.mrf.mxu0 }
 0x22a   : > { %v2196_v3 = vmax.f32 %v2178_v35, 0.0  ;;  %v2154_v26 = vadd.f32 %v2131_v47, %v1975_v40  ;;  %2252 = vmax.xlane.f32.xlu0 %v4529_v7 }
 0x22b   : > { %v3246_v60 = vpop.f32.mrf.mxu0 }
 0x22c   : > { %v2179_v18 = vadd.f32 %v4441_v55, %v2154_v26  ;;  %v4537_v36 = vadd.f32 %v4448_v5, %v2196_v3 }
 0x22d   : > { %v2134_v16 = vpop.f32.mrf.mxu0 }
 0x22e   : > { %v2197_v21 = vmax.f32 %v2179_v18, 0.0  ;;  %v2155_v22 = vadd.f32 %v2134_v16, %v1976_v27  ;;  %2254 = vmax.xlane.f32.xlu0 %v4537_v36 }
 0x22f   : > { %v3247_v12 = vpop.f32.mrf.mxu0 }
 0x230   : > { %v2180_v42 = vadd.f32 %v4441_v55, %v2155_v22  ;;  %v4546_v56 = vadd.f32 %v4448_v5, %v2197_v21 }
 0x232   : > { %v2198_v58 = vmax.f32 %v2180_v42, 0.0  ;;  %2242 = vmax.xlane.f32.xlu0 %v4543_v0  ;;  %2256 = vmax.xlane.f32.xlu1 %v4546_v56 }
 0x234   : > { %v4551_v49 = vadd.f32 %v4448_v5, %v2198_v58 }
 0x236   : > { %2258 = vmax.xlane.f32.xlu1 %v4551_v49 }
 0x23a   : > { %2244 = vmax.xlane.f32.xlu1 %v4555_v6 }
 0x27b   : > { %v2225_v55 = vpop.xlane.xlu0 %2224 }
 0x27c   : > { %v2260_v37 = vsub.f32 %v4453_v38, %v2225_v55 }
 0x27e   : > { %v2278_v4 = vmul.f32 1.442695, %v2260_v37 }
 0x27f   : > { %v2227_v50 = vpop.xlane.xlu1 %2226 }
 0x280   : > { %3363 = vpow2.f32 %v2278_v4  ;;  %v2261_v32 = vsub.f32 %v4459_v8, %v2227_v50 }
 0x282   : > { %v2280_v31 = vmul.f32 1.442695, %v2261_v32 }
 0x283   : > { %v2229_v29 = vpop.xlane.xlu0 %2228 }
 0x284   : > { %3365 = vpow2.f32 %v2280_v31  ;;  %v2262_v30 = vsub.f32 %v4465_v41, %v2229_v29 }
 0x286   : > { %v2282_v17 = vmul.f32 1.442695, %v2262_v30 }
 0x287   : > { %v2231_v14 = vpop.xlane.xlu0 %2230 }
 0x288   : > { %3367 = vpow2.f32 %v2282_v17  ;;  %v2263_v5 = vsub.f32 %v4471_v63, %v2231_v14 }
 0x28a   : > { %v2284_v57 = vmul.f32 1.442695, %v2263_v5 }
 0x28b   : > { %v2233_v61 = vpop.xlane.xlu1 %2232 }
 0x28c   : > { %3369 = vpow2.f32 %v2284_v57  ;;  %v2264_v38 = vsub.f32 %v4477_v46, %v2233_v61 }
 0x28d   : > { %v4563_v45 = vpop.eup %3363 }
 0x28e   : > { %v2286_v54 = vmul.f32 1.442695, %v2264_v38  ;;  %2314 = vadd.xlane.f32.xlu0 %v4563_v45 }
 0x28f   : > { %v2235_v8 = vpop.xlane.xlu0 %2234 }
 0x290   : > { %3371 = vpow2.f32 %v2286_v54  ;;  %v2265_v20 = vsub.f32 %v4483_v25, %v2235_v8 }
 0x291   : > { %v4567_v41 = vpop.eup %3365 }
 0x292   : > { %v2288_v44 = vmul.f32 1.442695, %v2265_v20  ;;  %2316 = vadd.xlane.f32.xlu1 %v4567_v41 }
 0x293   : > { %v2237_v63 = vpop.xlane.xlu0 %2236 }
 0x294   : > { %3373 = vpow2.f32 %v2288_v44  ;;  %v2266_v23 = vsub.f32 %v4489_v19, %v2237_v63 }
 0x295   : > { %v4571_v1 = vpop.eup %3367 }
 0x296   : > { %v2290_v46 = vmul.f32 1.442695, %v2266_v23  ;;  %2318 = vadd.xlane.f32.xlu0 %v4571_v1 }
 0x297   : > { %v2239_v48 = vpop.xlane.xlu1 %2238 }
 0x298   : > { %3375 = vpow2.f32 %v2290_v46  ;;  %v2267_v43 = vsub.f32 %v4496_v11, %v2239_v48 }
 0x299   : > { %v4575_v33 = vpop.eup %3369 }
 0x29a   : > { %v2292_v25 = vmul.f32 1.442695, %v2267_v43  ;;  %2320 = vadd.xlane.f32.xlu0 %v4575_v33 }
 0x29b   : > { %v2241_v51 = vpop.xlane.xlu1 %2240 }
 0x29c   : > { %3377 = vpow2.f32 %v2292_v25  ;;  %v2268_v59 = vsub.f32 %v4500_v62, %v2241_v51 }
 0x29d   : > { %v4579_v34 = vpop.eup %3371 }
 0x29e   : > { %v2294_v19 = vmul.f32 1.442695, %v2268_v59  ;;  %2322 = vadd.xlane.f32.xlu1 %v4579_v34 }
 0x2a0   : > { %3379 = vpow2.f32 %v2294_v19 }
 0x2a1   : > { %v4582_v39 = vpop.eup %3373 }
 0x2a2   : > { %2324 = vadd.xlane.f32.xlu1 %v4582_v39 }
 0x2a5   : > { %v4585_v11 = vpop.eup %3375 }
 0x2a6   : > { %2326 = vadd.xlane.f32.xlu0 %v4585_v11 }
 0x2a7   : > { %v2247_v40 = vpop.xlane.xlu0 %2246 }
 0x2a8   : > { %v2271_v35 = vsub.f32 %v4509_v24, %v2247_v40 }
 0x2a9   : > { %v4589_v2 = vpop.eup %3377 }
 0x2aa   : > { %v2300_v62 = vmul.f32 1.442695, %v2271_v35  ;;  %2328 = vadd.xlane.f32.xlu0 %v4589_v2 }
 0x2ab   : > { %v2249_v47 = vpop.xlane.xlu1 %2248 }
 0x2ac   : > { %3381 = vpow2.f32 %v2300_v62  ;;  %v2272_v10 = vsub.f32 %v4515_v13, %v2249_v47 }
 0x2ad   : > { %v4593_v3 = vpop.eup %3379 }
 0x2ae   : > { %v2302_v26 = vmul.f32 1.442695, %v2272_v10  ;;  %2330 = vadd.xlane.f32.xlu1 %v4593_v3 }
 0x2af   : > { %v2251_v52 = vpop.xlane.xlu1 %2250 }
 0x2b0   : > { %3383 = vpow2.f32 %v2302_v26  ;;  %v2273_v60 = vsub.f32 %v4522_v53, %v2251_v52 }
 0x2b2   : > { %v2304_v28 = vmul.f32 1.442695, %v2273_v60 }
 0x2b3   : > { %v2253_v24 = vpop.xlane.xlu0 %2252 }
 0x2b4   : > { %3385 = vpow2.f32 %v2304_v28  ;;  %v2274_v27 = vsub.f32 %v4529_v7, %v2253_v24 }
 0x2b6   : > { %v2306_v18 = vmul.f32 1.442695, %v2274_v27 }
 0x2b7   : > { %v2255_v16 = vpop.xlane.xlu0 %2254 }
 0x2b8   : > { %3387 = vpow2.f32 %v2306_v18  ;;  %v2275_v21 = vsub.f32 %v4537_v36, %v2255_v16 }
 0x2b9   : > { %v4599_v13 = vpop.eup %3381 }
 0x2ba   : > { %v2308_v22 = vmul.f32 1.442695, %v2275_v21  ;;  %2336 = vadd.xlane.f32.xlu0 %v4599_v13 }
 0x2bb   : > { %v2243_v12 = vpop.xlane.xlu0 %2242  ;;  %v2257_v15 = vpop.xlane.xlu1 %2256 }
 0x2bc   : > { %3389 = vpow2.f32 %v2308_v22  ;;  %v2269_v53 = vsub.f32 %v4543_v0, %v2243_v12  ;;  %v2276_v42 = vsub.f32 %v4546_v56, %v2257_v15 }
 0x2bd   : > { %v4604_v58 = vpop.eup %3383 }
 0x2be   : > { %v2296_v7 = vmul.f32 1.442695, %v2269_v53  ;;  %v2310_v9 = vmul.f32 1.442695, %v2276_v42  ;;  %2338 = vadd.xlane.f32.xlu1 %v4604_v58 }
 0x2bf   : > { %v2259_v55 = vpop.xlane.xlu1 %2258 }
 0x2c0   : > { %3391 = vpow2.f32 %v2296_v7  ;;  %v2277_v36 = vsub.f32 %v4551_v49, %v2259_v55 }
 0x2c1   : > { %v4608_v37 = vpop.eup %3385  ;;  %3393 = vpow2.f32 %v2310_v9 }
 0x2c2   : > { %v2312_v4 = vmul.f32 1.442695, %v2277_v36  ;;  %2340 = vadd.xlane.f32.xlu1 %v4608_v37 }
 0x2c3   : > { %v2245_v50 = vpop.xlane.xlu1 %2244 }
 0x2c4   : > { %3395 = vpow2.f32 %v2312_v4  ;;  %v2270_v0 = vsub.f32 %v4555_v6, %v2245_v50 }
 0x2c5   : > { %v4612_v56 = vpop.eup %3387 }
 0x2c6   : > { %v2298_v32 = vmul.f32 1.442695, %v2270_v0  ;;  %2342 = vadd.xlane.f32.xlu0 %v4612_v56 }
 0x2c8   : > { %3397 = vpow2.f32 %v2298_v32 }
 0x2c9   : > { %v4615_v31 = vpop.eup %3389 }
 0x2ca   : > { %2344 = vadd.xlane.f32.xlu0 %v4615_v31 }
 0x2cd   : > { %v4618_v49 = vpop.eup %3391 }
 0x2ce   : > { %v4620_v29 = vpop.eup %3393  ;;  %2332 = vadd.xlane.f32.xlu0 %v4618_v49 }
 0x2cf   : > { %2346 = vadd.xlane.f32.xlu1 %v4620_v29 }
 0x2d1   : > { %v4624_v6 = vpop.eup %3395 }
 0x2d3   : > { %2348 = vadd.xlane.f32.xlu1 %v4624_v6 }
 0x2d5   : > { %v4627_v30 = vpop.eup %3397 }
 0x2d7   : > { %2334 = vadd.xlane.f32.xlu1 %v4627_v30 }
 0x317   : > { %v2315_v17 = vpop.xlane.xlu0 %2314 }
 0x318   : > { %3399 = vrcp.f32 %v2315_v17 }
 0x31b   : > { %v2317_v14 = vpop.xlane.xlu1 %2316 }
 0x31c   : > { %3401 = vrcp.f32 %v2317_v14 }
 0x31f   : > { %v2319_v5 = vpop.xlane.xlu0 %2318 }
 0x320   : > { %3403 = vrcp.f32 %v2319_v5 }
 0x323   : > { %v2321_v57 = vpop.xlane.xlu0 %2320 }
 0x324   : > { %3405 = vrcp.f32 %v2321_v57 }
 0x325   : > { %v3400_v61 = vpop.eup %3399 }
 0x326   : > { %v2368_v8 = vmul.f32 %v3400_v61, %v4563_v45 }
 0x327   : > { %v2323_v38 = vpop.xlane.xlu1 %2322 }
 0x328   : > { %3407 = vrcp.f32 %v2323_v38 }
 0x329   : > { %v3402_v54 = vpop.eup %3401 }
 0x32a   : > { %v2369_v20 = vmul.f32 %v3402_v54, %v4567_v41 }
 0x32b   : > { %v2325_v44 = vpop.xlane.xlu1 %2324 }
 0x32c   : > { %v2808_v63 = vpack.c.bf16 %v2369_v20, %v2368_v8  ;;  %3409 = vrcp.f32 %v2325_v44 }
 0x32d   : > { %v3404_v23 = vpop.eup %3403 }
 0x32e   : > { %2809 = vst [vmem:[%s4635_s23] sm:$0xff] %v2808_v63   ;;  %v2370_v46 = vmul.f32 %v3404_v23, %v4571_v1 }
 0x32f   : > { %v2327_v48 = vpop.xlane.xlu0 %2326 }
 0x330   : > { %3411 = vrcp.f32 %v2327_v48  ;;  %v2789_v25 = vpack.c.bf16 %v2370_v46, %v2370_v46 }
 0x331   : > { %v3406_v43 = vpop.eup %3405 }
 0x332   : > { %v2371_v45 = vmul.f32 %v3406_v43, %v4575_v33  ;;  %v2762_v40 = vrot.slane %v2789_v25, 9 }
 0x333   : > { %v2329_v51 = vpop.xlane.xlu0 %2328 }
 0x334   : > { %v2790_v41 = vpack.c.bf16 %v2371_v45, %v2371_v45  ;;  %3413 = vrcp.f32 %v2329_v51 }
 0x335   : > { %v3408_v59 = vpop.eup %3407 }
 0x336   : > { %v2417_v35 = vrot.slane %v2790_v41, 5  ;;  %v2372_v1 = vmul.f32 %v3408_v59, %v4579_v34 }
 0x337   : > { %v2331_v62 = vpop.xlane.xlu1 %2330 }
 0x338   : > { %v2418_v47 = vsel %vm4641_vm11, %v2762_v40, %v2417_v35  ;;  %v2791_v10 = vpack.c.bf16 %v2372_v1, %v2372_v1  ;;  %3415 = vrcp.f32 %v2331_v62  ;;  %v2419_v26 = vrot.slane %v2417_v35, 4 }
 0x339   : > { %v3410_v33 = vpop.eup %3409  ;;  %2424 = vst [vmem:[%s4635_s23 + $0x8] sm:$0xf] %v2418_v47 }
 0x33a   : > { %v2420_v52 = vrot.slane %v2791_v10, 5  ;;  %v2373_v60 = vmul.f32 %v3410_v33, %v4582_v39  ;;  %v2765_v18 = vrot.slane %v2791_v10, 10 }
 0x33c   : > { %v2421_v28 = vsel %vm4641_vm11, %v2419_v26, %v2420_v52  ;;  %v2792_v24 = vpack.c.bf16 %v2373_v60, %v2373_v60 }
 0x33d   : > { %v3412_v34 = vpop.eup %3411  ;;  %2425 = vst [vmem:[%s4635_s23 + $0xc] sm:$0xf] %v2421_v28 }
 0x33e   : > { %v2436_v16 = vrot.slane %v2792_v24, 6  ;;  %v2374_v21 = vmul.f32 %v3412_v34, %v4585_v11 }
 0x340   : > { %v2437_v22 = vsel %vm4653_vm14, %v2765_v18, %v2436_v16  ;;  %v2793_v12 = vpack.c.bf16 %v2374_v21, %v2374_v21  ;;  %v2438_v15 = vrot.slane %v2436_v16, 4 }
 0x341   : > { %v3414_v39 = vpop.eup %3413  ;;  %2443 = vst [vmem:[%s4635_s23 + $0x10] sm:$0xf] %v2437_v22 }
 0x342   : > { %v2439_v53 = vrot.slane %v2793_v12, 6  ;;  %v2375_v42 = vmul.f32 %v3414_v39, %v4589_v2  ;;  %v2768_v4 = vrot.slane %v2793_v12, 11 }
 0x343   : > { %v2337_v7 = vpop.xlane.xlu0 %2336 }
 0x344   : > { %v2440_v9 = vsel %vm4653_vm14, %v2438_v15, %v2439_v53  ;;  %v2794_v55 = vpack.c.bf16 %v2375_v42, %v2375_v42  ;;  %3417 = vrcp.f32 %v2337_v7 }
 0x345   : > { %v3416_v11 = vpop.eup %3415  ;;  %2444 = vst [vmem:[%s4635_s23 + $0x14] sm:$0xf] %v2440_v9 }
 0x346   : > { %v2455_v50 = vrot.slane %v2794_v55, 7  ;;  %v2376_v0 = vmul.f32 %v3416_v11, %v4593_v3 }
 0x347   : > { %v2339_v32 = vpop.xlane.xlu1 %2338 }
 0x348   : > { %v2456_v2 = vsel %vm4665_vm1, %v2768_v4, %v2455_v50  ;;  %v2795_v17 = vpack.c.bf16 %v2376_v0, %v2376_v0  ;;  %3419 = vrcp.f32 %v2339_v32  ;;  %v2457_v14 = vrot.slane %v2455_v50, 4 }
 0x349   : > { %2462 = vst [vmem:[%s4635_s23 + $0x18] sm:$0xf] %v2456_v2 }
 0x34a   : > { %v2458_v5 = vrot.slane %v2795_v17, 7 }
 0x34b   : > { %v2341_v57 = vpop.xlane.xlu1 %2340 }
 0x34c   : > { %v2459_v61 = vsel %vm4665_vm1, %v2457_v14, %v2458_v5  ;;  %3421 = vrcp.f32 %v2341_v57 }
 0x34d   : > { %2463 = vst [vmem:[%s4635_s23 + $0x1c] sm:$0xf] %v2459_v61 }
 0x34f   : > { %v2343_v38 = vpop.xlane.xlu0 %2342 }
 0x350   : > { %3423 = vrcp.f32 %v2343_v38 }
 0x351   : > { %v3418_v54 = vpop.eup %3417 }
 0x352   : > { %v2379_v3 = vmul.f32 %v3418_v54, %v4599_v13 }
 0x353   : > { %v2345_v8 = vpop.xlane.xlu0 %2344 }
 0x354   : > { %3425 = vrcp.f32 %v2345_v8  ;;  %v2798_v44 = vpack.c.bf16 %v2379_v3, %v2379_v3 }
 0x355   : > { %v3420_v20 = vpop.eup %3419 }
 0x356   : > { %v2380_v63 = vmul.f32 %v3420_v20, %v4604_v58  ;;  %v2774_v43 = vrot.slane %v2798_v44, 9 }
 0x357   : > { %v2333_v41 = vpop.xlane.xlu0 %2332 }
 0x358   : > { %v2799_v23 = vpack.c.bf16 %v2380_v63, %v2380_v63  ;;  %v2347_v46 = vpop.xlane.xlu1 %2346 }
 0x359   : > { %v3422_v48 = vpop.eup %3421  ;;  %3427 = vrcp.f32 %v2347_v46 }
 0x35a   : > { %v2482_v25 = vrot.slane %v2799_v23, 5  ;;  %v2381_v45 = vmul.f32 %v3422_v48, %v4608_v37 }
 0x35c   : > { %v2483_v51 = vsel %vm4641_vm11, %v2774_v43, %v2482_v25  ;;  %v2800_v13 = vpack.c.bf16 %v2381_v45, %v2381_v45  ;;  %v2349_v59 = vpop.xlane.xlu1 %2348  ;;  %v2484_v58 = vrot.slane %v2482_v25, 4 }
 0x35d   : > { %v3424_v40 = vpop.eup %3423  ;;  %2489 = vst [vmem:[%s4635_s23 + $0x28] sm:$0xf] %v2483_v51  ;;  %3429 = vrcp.f32 %v2349_v59 }
 0x35e   : > { %v2485_v35 = vrot.slane %v2800_v13, 5  ;;  %v2382_v1 = vmul.f32 %v3424_v40, %v4612_v56  ;;  %3431 = vrcp.f32 %v2333_v41  ;;  %v2777_v33 = vrot.slane %v2800_v13, 10 }
 0x360   : > { %v2486_v62 = vsel %vm4641_vm11, %v2484_v58, %v2485_v35  ;;  %v2801_v37 = vpack.c.bf16 %v2382_v1, %v2382_v1  ;;  %v2335_v47 = vpop.xlane.xlu1 %2334 }
 0x361   : > { %v3426_v10 = vpop.eup %3425  ;;  %2490 = vst [vmem:[%s4635_s23 + $0x2c] sm:$0xf] %v2486_v62  ;;  %3433 = vrcp.f32 %v2335_v47 }
 0x362   : > { %v2498_v26 = vrot.slane %v2801_v37, 6  ;;  %v2383_v52 = vmul.f32 %v3426_v10, %v4615_v31 }
 0x364   : > { %v2499_v60 = vsel %vm4653_vm14, %v2777_v33, %v2498_v26  ;;  %v2802_v56 = vpack.c.bf16 %v2383_v52, %v2383_v52  ;;  %v2500_v19 = vrot.slane %v2498_v26, 4 }
 0x365   : > { %2505 = vst [vmem:[%s4635_s23 + $0x30] sm:$0xf] %v2499_v60 }
 0x366   : > { %v3428_v28 = vpop.eup %3427  ;;  %v2501_v24 = vrot.slane %v2802_v56, 6  ;;  %v2780_v21 = vrot.slane %v2802_v56, 11 }
 0x367   : > { %v2384_v34 = vmul.f32 %v3428_v28, %v4620_v29 }
 0x368   : > { %v2502_v18 = vsel %vm4653_vm14, %v2500_v19, %v2501_v24 }
 0x369   : > { %2506 = vst [vmem:[%s4635_s23 + $0x34] sm:$0xf] %v2502_v18  ;;  %v2803_v16 = vpack.c.bf16 %v2384_v34, %v2384_v34 }
 0x36a   : > { %v3430_v31 = vpop.eup %3429 }
 0x36b   : > { %v2514_v22 = vrot.slane %v2803_v16, 7  ;;  %v2385_v12 = vmul.f32 %v3430_v31, %v4624_v6  ;;  %v3432_v39 = vpop.eup %3431 }
 0x36c   : > { %v2377_v53 = vmul.f32 %v3432_v39, %v4618_v49 }
 0x36d   : > { %v2515_v29 = vsel %vm4665_vm1, %v2780_v21, %v2514_v22  ;;  %v2804_v15 = vpack.c.bf16 %v2385_v12, %v2385_v12  ;;  %v2516_v42 = vrot.slane %v2514_v22, 4 }
 0x36e   : > { %v3434_v27 = vpop.eup %3433  ;;  %2521 = vst [vmem:[%s4635_s23 + $0x38] sm:$0xf] %v2515_v29 }
 0x36f   : > { %v2517_v7 = vrot.slane %v2804_v15, 7  ;;  %v2378_v9 = vmul.f32 %v3434_v27, %v4627_v30 }
 0x371   : > { %v2518_v6 = vsel %vm4665_vm1, %v2516_v42, %v2517_v7  ;;  %v2813_v55 = vpack.c.bf16 %v2378_v9, %v2377_v53 }
 0x372   : > { %2522 = vst [vmem:[%s4635_s23 + $0x3c] sm:$0xf] %v2518_v6 }
 0x373   : > { %2815 = vst [vmem:[%s4635_s23 + $0x20] sm:$0xff] %v2813_v55  }
 0x374   : > { %3448 = shalt.err (!%p3445_p7)
}
 0x375   : > { %s3449_s13 = scalar_lea.hbm %s4706_s9, 1024  ;;  %s3453_s27 = scalar_lea.hbm %s4771_s4, 4096 }
 0x376   : > { %p3450_p9 = scmp.ne.s32.totalorder %s4706_s9, %s3449_s13  ;;  %p3454_p12 = scmp.lt.s32.totalorder %s4706_s9, %s4771_s4 }
 0x377   : > { %p3455_p13 = scmp.lt.s32.totalorder %s3453_s27, %s3449_s13 }
 0x378   : > { %p3451_p10 = pnand %p3450_p9, %p3611_p3 }
 0x379   : > { %p3456_p0 = por %p3455_p13, %p3454_p12 }
 0x37a   : > { %p3452_p11 = pneg %p3451_p10 }
 0x37c   : > { %p3457_p1 = pnand %p3456_p0, %p3452_p11 }
 0x37e   : > { %3460 = shalt.err (!%p3457_p1)
}
 0x37f   : > { %s3533_s6 = smov 64   ;;  %s3534_s8 = smov 4  }
 0x380   : > { %3252 = dma.vmem_to_hbm [thread:$0]  (%p3611_p3), %s4708_s19, 1024, %s4706_s9, %s4716_s30, %s3533_s6, %s3533_s6, %s3534_s8  }
 0x381 PF: > { %p3258_p2 = scmp.ge.s32.totalorder %s3527_s22, 2  ;;  %s2554_s10 = sand.u32 1, %s3499_s15  }
 0x382   : > { %s2555_s11 = scalar_lea.sflag [#allocation3], %s2554_s10 }
 0x383   : > { %p3255_p4 = pnand %p3258_p2, %p3620_p8 }
 0x385   : > { %p3256_p5 = pneg %p3255_p4 }
 0x387   : > { %3494 = dma.done.wait (%p3256_p5), %s2555_s11, 1024  }
 0x388   : > { %3496 = vsyncadd (%p3256_p5), %s2555_s11, 4294966272  ;;  %s17_s22 = sadd.s32 1, %s3527_s22   ;;  %s4780_s15 = smov %s3503_s16 }
 0x389   : > { %p14_p6 = scmp.ge.s32.totalorder %s17_s22, 6   ;;  %s4781_s16 = smov %s3507_s17 }
 0x38a   : > { %s4782_s17 = smov %s3629_s7  ;;  %s4783_s18 = smov %s3519_s20 }
 0x38b   : > { %s4784_s19 = smov %s3523_s21  ;;  %s4785_s20 = smov %s4788_s25 }
 0x38c   : > { %s4786_s21 = smov %s4792_s26  ;;  %16 = sbr.rel (!%p14_p6) target bundleno = 5 (0x5), region = 79 }
 0x391   :  { %2560 = vsyncpa [#allocation3], 1 }
 0x392   :  { %2562 = vsyncpa [#allocation3 + $0x1], 1 }

</bundles_post_ra>
